<compile_context>
chip_gen: v7x
topology: tpu7x:2x2x1
jax: 0.10.0
libtpu: 0.0.40
codegen_flags: <defaults>
</compile_context>

<pallas_src>
import functools
import math

import jax
import jax.numpy as jnp
from jax.experimental import pallas as pl
from jax.experimental.pallas import tpu as pltpu


_INV_SQRT2 = 0.7071067811865476
# Explicit scoped-VMEM limit: above v5e's 16 MiB default, below v7x's 64 MiB physical.
_VMEM_LIMIT_BYTES = 48 * 1024 * 1024
# Working-set budget used to size the row tile (headroom vs the limit above).
_VMEM_BUDGET_BYTES = 40 * 1024 * 1024


def _erf_approx(x):
    """erf via Abramowitz & Stegun 7.1.26 (max abs error ~1.5e-7), f32 in/out."""
    p = 0.3275911
    a1, a2, a3, a4, a5 = (0.254829592, -0.284496736, 1.421413741,
                          -1.453152027, 1.061405429)
    ax = jnp.abs(x)
    t = 1.0 / (1.0 + p * ax)
    poly = ((((a5 * t + a4) * t + a3) * t + a2) * t + a1) * t
    y = 1.0 - poly * jnp.exp(-ax * ax)
    return jnp.where(x < 0.0, -y, y)


def _gelu(x):
    # Matches the PyTorch module's erf-based gelu (not the tanh approximation).
    return 0.5 * x * (1.0 + _erf_approx(x * _INV_SQRT2))


def _prediction_head_kernel(x_ref, wt_ref, bt_ref, g_ref, b_ref,
                            wd_ref, bd_ref, o_ref, *, eps):
    """out = (LayerNorm(gelu(x @ Wt + bt)) * gamma + beta) @ Wd + bd."""
    # Transform dense: operands in the weight dtype (bf16 if weights are bf16)
    # feed the MXU at full rate; accumulate in f32.
    x = x_ref[...].astype(wt_ref.dtype)
    y = jnp.dot(x, wt_ref[...], preferred_element_type=jnp.float32)
    y = y + bt_ref[...].astype(jnp.float32)
    # GELU (erf form), computed in f32.
    y = _gelu(y)
    # TF-style LayerNorm (eps inside the sqrt); rsqrt goes to the EUP slot.
    # (One-pass E[y^2]-E[y]^2 variance is an option if VALU ever binds; the two
    #  dots dominate here so keep the numerically clearer two-pass form.)
    u = jnp.mean(y, axis=-1, keepdims=True)
    yc = y - u
    var = jnp.mean(yc * yc, axis=-1, keepdims=True)
    yn = yc * jax.lax.rsqrt(var + eps)
    yn = g_ref[...].astype(jnp.float32) * yn + b_ref[...].astype(jnp.float32)
    # Decoder dense (lane-dense output width), operands in the weight dtype.
    out = jnp.dot(yn.astype(wd_ref.dtype), wd_ref[...],
                  preferred_element_type=jnp.float32)
    out = out + bd_ref[...].astype(jnp.float32)
    o_ref[...] = out.astype(o_ref.dtype)


def _round_up(x, m):
    return (x + m - 1) // m * m


def _choose_tm(M, max_tm, min_row_tiles=1):
    """Largest multiple of 8 that divides M, <= max_tm, giving >= min_row_tiles tiles."""
    best = None
    t = 8
    limit = min(M, max_tm)
    while t <= limit:
        if M % t == 0 and (M // t) >= min_row_tiles:
            best = t
        t += 8
    return best


def _auto_max_tm(K, T, x_bytes, w_bytes, out_bytes,
                 budget=_VMEM_BUDGET_BYTES, cap=512):
    """Largest row tile whose VMEM working set fits the budget.

    Working set = single-buffered weights/biases + double-buffered x/out row
    tiles + f32 in-kernel temporaries (y and the f32 output accumulator).
    """
    resident_w = (K * K + K * T + 4 * K + T) * w_bytes
    tm = cap
    while tm > 8:
        io = 2 * tm * K * x_bytes + 2 * tm * T * out_bytes
        tmp = tm * K * 8 + tm * T * 4   # f32 y (+slack) and f32 out accumulator
        if resident_w + io + tmp <= budget:
            break
        tm -= 8
    return tm


def _make_in_specs(tm, K, T, single_buffer_weights):
    """Input BlockSpecs; weight/bias blocks are grid-invariant along the row axis."""
    if single_buffer_weights:
        def w_spec(shape, imap):
            return pl.BlockSpec(shape, imap,
                                pipeline_mode=pl.Buffered(buffer_count=1))
    else:
        def w_spec(shape, imap):
            return pl.BlockSpec(shape, imap)
    return [
        pl.BlockSpec((None, tm, K), lambda g, i: (g, i, 0)),   # x rows (double-buffered)
        w_spec((None, K, K), lambda g, i: (g, 0, 0)),          # Wt (resident per head)
        w_spec((None, 1, K), lambda g, i: (g, 0, 0)),          # bt
        w_spec((None, 1, K), lambda g, i: (g, 0, 0)),          # gamma
        w_spec((None, 1, K), lambda g, i: (g, 0, 0)),          # beta
        w_spec((None, K, T), lambda g, i: (g, 0, 0)),          # Wd (resident per head)
        w_spec((None, 1, T), lambda g, i: (g, 0, 0)),          # bd
    ]


def prediction_heads(x, wt, bt, gamma, beta, wd, bd, *, eps=1e-12, max_tm=None):
    """Fused transform + GELU + LayerNorm + decoder for a stack of heads.

    x:             (G, B, S, K)   stacked sequence outputs (heads share shapes)
    wt:            (G, K, K)      transform dense weight, (in, out) layout
    bt/gamma/beta: (G, K)
    wd:            (G, K, T)      decoder weight, (in, out) layout
    bd:            (G, T)
    returns        (G, B, S, T)   in x.dtype
    """
    G, B, S, K = x.shape
    T = wd.shape[-1]
    M = B * S

    if max_tm is None:
        max_tm = _auto_max_tm(K, T, x.dtype.itemsize, wt.dtype.itemsize,
                              x.dtype.itemsize)

    # Keep >= 2 row tiles for single-head calls so the v7x megacore has >= 2
    # parallel grid steps to shard.
    min_row_tiles = 2 if G == 1 else 1
    tm = _choose_tm(M, max_tm, min_row_tiles) or _choose_tm(M, max_tm, 1)
    if tm is None:
        # Fallback only when M is not a multiple of 8: pad rows (and slice after).
        # TODO(synk): if the output dtype ever becomes fp8/int8, mask padded rows
        #             instead of relying on the slice (rsqrt(eps)-scale values).
        tm = min(_round_up(M, 8), max_tm)
        Mp = _round_up(M, tm)
    else:
        Mp = M

    x2 = x.reshape(G, M, K)
    if Mp != M:
        x2 = jnp.pad(x2, ((0, 0), (0, Mp - M), (0, 0)))

    bt2 = bt.reshape(G, 1, K)
    g2 = gamma.reshape(G, 1, K)
    be2 = beta.reshape(G, 1, K)
    bd2 = bd.reshape(G, 1, T)

    kernel = functools.partial(_prediction_head_kernel, eps=eps)

    # Advisory cost estimate so XLA overlaps the surrounding stack/concat glue.
    cost = pl.CostEstimate(
        flops=2 * G * Mp * K * (K + T),
        transcendentals=G * Mp * (K + 1),        # exp in erf-GELU + rsqrt per row
        bytes_accessed=(x2.size * x2.dtype.itemsize
                        + (wt.size + wd.size) * wt.dtype.itemsize
                        + (bt.size + gamma.size + beta.size + bd.size)
                        * bt.dtype.itemsize
                        + G * Mp * T * x.dtype.itemsize))

    out_shape = jax.ShapeDtypeStruct((G, Mp, T), x.dtype)
    out_spec = pl.BlockSpec((None, tm, T), lambda g, i: (g, i, 0))
    compiler_params = pltpu.CompilerParams(
        dimension_semantics=("parallel", "parallel"),
        vmem_limit_bytes=_VMEM_LIMIT_BYTES)

    out = None
    # First attempt single-buffers the grid-invariant weight blocks (halves their
    # VMEM footprint); retry with default double buffering if this jax build does
    # not support pipeline_mode=pl.Buffered(1).
    for single_buffer_weights in (True, False):
        try:
            out = pl.pallas_call(
                kernel,
                out_shape=out_shape,
                grid_spec=pltpu.PrefetchScalarGridSpec(
                    num_scalar_prefetch=0,
                    grid=(G, Mp // tm),
                    in_specs=_make_in_specs(tm, K, T, single_buffer_weights),
                    out_specs=out_spec),
                compiler_params=compiler_params,
                cost_estimate=cost,
            )(x2, wt, bt2, g2, be2, wd, bd2)
            break
        except Exception:
            if not single_buffer_weights:
                raise

    if Mp != M:
        out = out[:, :M, :]
    return out.reshape(G, B, S, T)


def prepare_params(raw, dtype=None):
    """One-time parameter prep (call OUTSIDE the per-step forward).

    * Pre-stacks the img + pose heads (identical shapes) into (2, ...) arrays so
      the forward pass does no per-call jnp.stack HBM copies of the weights.
    * Optionally casts weights to bf16 so both dots feed the MXU native bf16
      (f32 accumulation) and weight DMA / VMEM residency is halved.
    """
    cvt = (lambda a: a) if dtype is None else (lambda a: a.astype(dtype))
    st = lambda a, b: jnp.stack([cvt(a), cvt(b)], axis=0)
    return {
        "vp_wt": st(raw["img_wt"], raw["pose_wt"]),
        "vp_bt": st(raw["img_bt"], raw["pose_bt"]),
        "vp_ln_g": st(raw["img_ln_g"], raw["pose_ln_g"]),
        "vp_ln_b": st(raw["img_ln_b"], raw["pose_ln_b"]),
        "vp_wd": st(raw["img_wd"], raw["pose_wd"]),
        "vp_bd": st(raw["img_bd"], raw["pose_bd"]),
        "a_wt": cvt(raw["aud_wt"])[None],
        "a_bt": cvt(raw["aud_bt"])[None],
        "a_ln_g": cvt(raw["aud_ln_g"])[None],
        "a_ln_b": cvt(raw["aud_ln_b"])[None],
        "a_wd": cvt(raw["aud_wd"])[None],
        "a_bd": cvt(raw["aud_bd"])[None],
    }


def bert_pretraining_heads_forward(params,
                                   sequence_output_v, sequence_output_p,
                                   sequence_output_a,
                                   pooled_output_v, pooled_output_p,
                                   pooled_output_a):
    """Forward of BertPreTrainingHeads (fusion_method='cat', eval mode).

    `params` must come from prepare_params() (weights pre-stacked / pre-cast).
    """
    # Image + pose heads are both BertImagePredictionHead (v_hidden -> v_target):
    # one fused pallas_call with a leading head grid axis.
    x_vp = jnp.stack([sequence_output_v, sequence_output_p], axis=0)
    out_vp = prediction_heads(x_vp, params["vp_wt"], params["vp_bt"],
                              params["vp_ln_g"], params["vp_ln_b"],
                              params["vp_wd"], params["vp_bd"])
    prediction_scores_v, prediction_scores_p = out_vp[0], out_vp[1]

    prediction_scores_a = prediction_heads(
        sequence_output_a[None], params["a_wt"], params["a_bt"],
        params["a_ln_g"], params["a_ln_b"], params["a_wd"], params["a_bd"])[0]

    # fusion_method == 'cat': pure layout op; dropout is identity in eval mode.
    pooled_output = jnp.concatenate(
        [pooled_output_v, pooled_output_p, pooled_output_a], axis=2)

    return (prediction_scores_v, prediction_scores_p, prediction_scores_a,
            pooled_output)


def _reference(raw, sv, sp, sa, pv, pp, pa, eps=1e-12):
    """Pure-JAX reference (exact erf gelu) for correctness checking."""
    from jax.scipy.special import erf

    def gelu(x):
        return 0.5 * x * (1.0 + erf(x / jnp.sqrt(2.0)))

    def head(x, wt, bt, g, b, wd, bd):
        y = jnp.einsum("bsk,kn->bsn", x, wt) + bt
        y = gelu(y)
        u = y.mean(-1, keepdims=True)
        s = ((y - u) ** 2).mean(-1, keepdims=True)
        y = (y - u) / jnp.sqrt(s + eps)
        y = g * y + b
        return jnp.einsum("bsk,kt->bst", y, wd) + bd

    out_v = head(sv, raw["img_wt"], raw["img_bt"], raw["img_ln_g"],
                 raw["img_ln_b"], raw["img_wd"], raw["img_bd"])
    out_p = head(sp, raw["pose_wt"], raw["pose_bt"], raw["pose_ln_g"],
                 raw["pose_ln_b"], raw["pose_wd"], raw["pose_bd"])
    out_a = head(sa, raw["aud_wt"], raw["aud_bt"], raw["aud_ln_g"],
                 raw["aud_ln_b"], raw["aud_wd"], raw["aud_bd"])
    pooled = jnp.concatenate([pv, pp, pa], axis=2)
    return out_v, out_p, out_a, pooled


if __name__ == "__main__":
    # Small config consistent with the module.
    B, S = 2, 8
    bi_hidden = 32     # config.bi_hidden_size (pooled outputs)
    v_hidden = 64      # config.v_hidden_size (image & pose heads)
    a_hidden = 32      # config.a_hidden_size (audio head)
    v_target = 128     # config.v_target_size (lane-dense output width)

    key = jax.random.PRNGKey(0)
    ks = jax.random.split(key, 24)

    def init_linear(kw, kb, din, dout):
        lim = 1.0 / math.sqrt(din)
        w = jax.random.uniform(kw, (din, dout), jnp.float32, -lim, lim)
        b = jax.random.uniform(kb, (dout,), jnp.float32, -lim, lim)
        return w, b

    img_wt, img_bt = init_linear(ks[0], ks[1], v_hidden, v_hidden)
    img_wd, img_bd = init_linear(ks[2], ks[3], v_hidden, v_target)
    pose_wt, pose_bt = init_linear(ks[4], ks[5], v_hidden, v_hidden)
    pose_wd, pose_bd = init_linear(ks[6], ks[7], v_hidden, v_target)
    aud_wt, aud_bt = init_linear(ks[8], ks[9], a_hidden, a_hidden)
    aud_wd, aud_bd = init_linear(ks[10], ks[11], a_hidden, v_target)

    raw = dict(
        img_wt=img_wt, img_bt=img_bt,
        img_ln_g=jnp.ones((v_hidden,), jnp.float32),
        img_ln_b=jnp.zeros((v_hidden,), jnp.float32),
        img_wd=img_wd, img_bd=img_bd,
        pose_wt=pose_wt, pose_bt=pose_bt,
        pose_ln_g=jnp.ones((v_hidden,), jnp.float32),
        pose_ln_b=jnp.zeros((v_hidden,), jnp.float32),
        pose_wd=pose_wd, pose_bd=pose_bd,
        aud_wt=aud_wt, aud_bt=aud_bt,
        aud_ln_g=jnp.ones((a_hidden,), jnp.float32),
        aud_ln_b=jnp.zeros((a_hidden,), jnp.float32),
        aud_wd=aud_wd, aud_bd=aud_bd,
    )

    sv = jax.random.normal(ks[12], (B, S, v_hidden), jnp.float32)
    sp = jax.random.normal(ks[13], (B, S, v_hidden), jnp.float32)
    sa = jax.random.normal(ks[14], (B, S, a_hidden), jnp.float32)
    pv = jax.random.normal(ks[15], (B, 1, bi_hidden), jnp.float32)
    pp = jax.random.normal(ks[16], (B, 1, bi_hidden), jnp.float32)
    pa = jax.random.normal(ks[17], (B, 1, bi_hidden), jnp.float32)

    refs = _reference(raw, sv, sp, sa, pv, pp, pa)
    names = ("scores_v", "scores_p", "scores_a", "pooled")

    # --- f32 weights: tight correctness check -------------------------------
    params_f32 = prepare_params(raw)                  # one-time prep (pre-stacked)
    outs = bert_pretraining_heads_forward(params_f32, sv, sp, sa, pv, pp, pa)
    jax.block_until_ready(outs)
    for name, o, r in zip(names, outs, refs):
        assert o.shape == r.shape, (name, o.shape, r.shape)
        err = float(jnp.max(jnp.abs(o.astype(jnp.float32) - r)))
        assert jnp.allclose(o.astype(jnp.float32), r, atol=2e-5, rtol=2e-5), (name, err)

    # --- bf16 weights: MXU runs native bf16 (looser tolerance on purpose) ----
    params_bf16 = prepare_params(raw, dtype=jnp.bfloat16)
    outs_bf16 = bert_pretraining_heads_forward(params_bf16, sv, sp, sa, pv, pp, pa)
    jax.block_until_ready(outs_bf16)
    for name, o, r in zip(names[:3], outs_bf16[:3], refs[:3]):
        assert o.shape == r.shape, (name, o.shape, r.shape)
        err = float(jnp.max(jnp.abs(o.astype(jnp.float32) - r)))
        assert jnp.allclose(o.astype(jnp.float32), r, atol=5e-2, rtol=5e-2), (name, err)

    assert outs[0].shape == (B, S, v_target)
    assert outs[1].shape == (B, S, v_target)
    assert outs[2].shape == (B, S, v_target)
    assert outs[3].shape == (B, 1, 3 * bi_hidden)

    print("KERNEL_OK")
</pallas_src>

<mosaic_0001>
module attributes {stable_mosaic.version = 11 : i64} {
  func.func @_prediction_head_kernel(%arg0: i32, %arg1: i32, %arg2: memref<1x16x64xf32, #tpu.memory_space<vmem>>, %arg3: memref<1x64x64xf32, #tpu.memory_space<vmem>>, %arg4: memref<1x1x64xf32, #tpu.memory_space<vmem>>, %arg5: memref<1x1x64xf32, #tpu.memory_space<vmem>>, %arg6: memref<1x1x64xf32, #tpu.memory_space<vmem>>, %arg7: memref<1x64x128xf32, #tpu.memory_space<vmem>>, %arg8: memref<1x1x128xf32, #tpu.memory_space<vmem>>, %arg9: memref<1x16x128xf32, #tpu.memory_space<vmem>>) attributes {dimension_semantics = [#tpu.dimension_semantics<parallel>, #tpu.dimension_semantics<parallel>], iteration_bounds = array<i64: 2, 1>, scalar_prefetch = 0 : i64, scratch_operands = 0 : i64, tpu.core_type = #tpu.core_type<tc>, window_params = [{transform_indices = @transform_0, window_bounds = array<i64: 1, 16, 64>}, {pipeline_mode = #tpu.pipeline_mode<synchronous>, transform_indices = @transform_1, window_bounds = array<i64: 1, 64, 64>}, {pipeline_mode = #tpu.pipeline_mode<synchronous>, transform_indices = @transform_2, window_bounds = array<i64: 1, 1, 64>}, {pipeline_mode = #tpu.pipeline_mode<synchronous>, transform_indices = @transform_3, window_bounds = array<i64: 1, 1, 64>}, {pipeline_mode = #tpu.pipeline_mode<synchronous>, transform_indices = @transform_4, window_bounds = array<i64: 1, 1, 64>}, {pipeline_mode = #tpu.pipeline_mode<synchronous>, transform_indices = @transform_5, window_bounds = array<i64: 1, 64, 128>}, {pipeline_mode = #tpu.pipeline_mode<synchronous>, transform_indices = @transform_6, window_bounds = array<i64: 1, 1, 128>}, {transform_indices = @transform_7, window_bounds = array<i64: 1, 16, 128>}]} {
    %c0 = arith.constant 0 : index
    %c0_0 = arith.constant 0 : index
    %c0_1 = arith.constant 0 : index
    %0 = vector.load %arg2[%c0, %c0_0, %c0_1] : memref<1x16x64xf32, #tpu.memory_space<vmem>>, vector<1x16x64xf32>
    %1 = vector.shape_cast %0 : vector<1x16x64xf32> to vector<16x64xf32>
    %c0_2 = arith.constant 0 : index
    %c0_3 = arith.constant 0 : index
    %c0_4 = arith.constant 0 : index
    %2 = vector.load %arg3[%c0_2, %c0_3, %c0_4] : memref<1x64x64xf32, #tpu.memory_space<vmem>>, vector<1x64x64xf32>
    %3 = vector.shape_cast %2 : vector<1x64x64xf32> to vector<64x64xf32>
    %cst = arith.constant dense<0.000000e+00> : vector<16x64xf32>
    %4 = tpu.matmul %1, %3, %cst {dimension_numbers = #tpu.dot_dimension_numbers<[1], [0], [0], [1], [0, 0, 1, 1], [], []>} : vector<16x64xf32>, vector<64x64xf32>, vector<16x64xf32> -> vector<16x64xf32>
    %c0_5 = arith.constant 0 : index
    %c0_6 = arith.constant 0 : index
    %c0_7 = arith.constant 0 : index
    %5 = vector.load %arg4[%c0_5, %c0_6, %c0_7] : memref<1x1x64xf32, #tpu.memory_space<vmem>>, vector<1x1x64xf32>
    %6 = vector.shape_cast %5 : vector<1x1x64xf32> to vector<1x64xf32>
    %7 = vector.broadcast %6 : vector<1x64xf32> to vector<16x64xf32>
    %8 = arith.addf %4, %7 : vector<16x64xf32>
    %cst_8 = arith.constant 5.000000e-01 : f32
    %9 = vector.broadcast %cst_8 : f32 to vector<16x64xf32>
    %10 = arith.mulf %9, %8 : vector<16x64xf32>
    %cst_9 = arith.constant 0.707106769 : f32
    %11 = vector.broadcast %cst_9 : f32 to vector<16x64xf32>
    %12 = arith.mulf %8, %11 : vector<16x64xf32>
    %13 = math.absf %12 : vector<16x64xf32>
    %cst_10 = arith.constant 0.327591091 : f32
    %14 = vector.broadcast %cst_10 : f32 to vector<16x64xf32>
    %15 = arith.mulf %14, %13 : vector<16x64xf32>
    %cst_11 = arith.constant 1.000000e+00 : f32
    %16 = vector.broadcast %cst_11 : f32 to vector<16x64xf32>
    %17 = arith.addf %16, %15 : vector<16x64xf32>
    %cst_12 = arith.constant 1.000000e+00 : f32
    %18 = vector.broadcast %cst_12 : f32 to vector<16x64xf32>
    %19 = arith.divf %18, %17 : vector<16x64xf32>
    %cst_13 = arith.constant 1.06140542 : f32
    %20 = vector.broadcast %cst_13 : f32 to vector<16x64xf32>
    %21 = arith.mulf %20, %19 : vector<16x64xf32>
    %cst_14 = arith.constant -1.45315206 : f32
    %22 = vector.broadcast %cst_14 : f32 to vector<16x64xf32>
    %23 = arith.addf %21, %22 : vector<16x64xf32>
    %24 = arith.mulf %23, %19 : vector<16x64xf32>
    %cst_15 = arith.constant 1.42141378 : f32
    %25 = vector.broadcast %cst_15 : f32 to vector<16x64xf32>
    %26 = arith.addf %24, %25 : vector<16x64xf32>
    %27 = arith.mulf %26, %19 : vector<16x64xf32>
    %cst_16 = arith.constant -0.284496725 : f32
    %28 = vector.broadcast %cst_16 : f32 to vector<16x64xf32>
    %29 = arith.addf %27, %28 : vector<16x64xf32>
    %30 = arith.mulf %29, %19 : vector<16x64xf32>
    %cst_17 = arith.constant 0.254829586 : f32
    %31 = vector.broadcast %cst_17 : f32 to vector<16x64xf32>
    %32 = arith.addf %30, %31 : vector<16x64xf32>
    %33 = arith.mulf %32, %19 : vector<16x64xf32>
    %cst_18 = arith.constant 0.000000e+00 : f32
    %34 = vector.broadcast %cst_18 : f32 to vector<16x64xf32>
    %35 = arith.subf %34, %13 : vector<16x64xf32>
    %36 = arith.mulf %35, %13 : vector<16x64xf32>
    %37 = math.exp %36 : vector<16x64xf32>
    %38 = arith.mulf %33, %37 : vector<16x64xf32>
    %cst_19 = arith.constant 1.000000e+00 : f32
    %39 = vector.broadcast %cst_19 : f32 to vector<16x64xf32>
    %40 = arith.subf %39, %38 : vector<16x64xf32>
    %cst_20 = arith.constant 0.000000e+00 : f32
    %41 = vector.broadcast %cst_20 : f32 to vector<16x64xf32>
    %42 = arith.cmpf olt, %12, %41 : vector<16x64xf32>
    %cst_21 = arith.constant 0.000000e+00 : f32
    %43 = vector.broadcast %cst_21 : f32 to vector<16x64xf32>
    %44 = arith.subf %43, %40 : vector<16x64xf32>
    %45 = arith.select %42, %44, %40 : vector<16x64xi1>, vector<16x64xf32>
    %cst_22 = arith.constant 1.000000e+00 : f32
    %46 = vector.broadcast %cst_22 : f32 to vector<16x64xf32>
    %47 = arith.addf %46, %45 : vector<16x64xf32>
    %48 = arith.mulf %10, %47 : vector<16x64xf32>
    %cst_23 = arith.constant dense<0.000000e+00> : vector<16xf32>
    %49 = vector.multi_reduction <add>, %48, %cst_23 [1] : vector<16x64xf32> to vector<16xf32>
    %50 = vector.shape_cast %49 : vector<16xf32> to vector<16x1xf32>
    %cst_24 = arith.constant 6.400000e+01 : f32
    %51 = vector.broadcast %cst_24 : f32 to vector<16x1xf32>
    %52 = arith.divf %50, %51 : vector<16x1xf32>
    %53 = vector.broadcast %52 : vector<16x1xf32> to vector<16x64xf32>
    %54 = arith.subf %48, %53 : vector<16x64xf32>
    %55 = arith.mulf %54, %54 : vector<16x64xf32>
    %cst_25 = arith.constant dense<0.000000e+00> : vector<16xf32>
    %56 = vector.multi_reduction <add>, %55, %cst_25 [1] : vector<16x64xf32> to vector<16xf32>
    %57 = vector.shape_cast %56 : vector<16xf32> to vector<16x1xf32>
    %cst_26 = arith.constant 6.400000e+01 : f32
    %58 = vector.broadcast %cst_26 : f32 to vector<16x1xf32>
    %59 = arith.divf %57, %58 : vector<16x1xf32>
    %cst_27 = arith.constant 9.99999996E-13 : f32
    %60 = vector.broadcast %cst_27 : f32 to vector<16x1xf32>
    %61 = arith.addf %59, %60 : vector<16x1xf32>
    %62 = math.rsqrt %61 : vector<16x1xf32>
    %63 = vector.broadcast %62 : vector<16x1xf32> to vector<16x64xf32>
    %64 = arith.mulf %54, %63 : vector<16x64xf32>
    %c0_28 = arith.constant 0 : index
    %c0_29 = arith.constant 0 : index
    %c0_30 = arith.constant 0 : index
    %65 = vector.load %arg5[%c0_28, %c0_29, %c0_30] : memref<1x1x64xf32, #tpu.memory_space<vmem>>, vector<1x1x64xf32>
    %66 = vector.shape_cast %65 : vector<1x1x64xf32> to vector<1x64xf32>
    %67 = vector.broadcast %66 : vector<1x64xf32> to vector<16x64xf32>
    %68 = arith.mulf %67, %64 : vector<16x64xf32>
    %c0_31 = arith.constant 0 : index
    %c0_32 = arith.constant 0 : index
    %c0_33 = arith.constant 0 : index
    %69 = vector.load %arg6[%c0_31, %c0_32, %c0_33] : memref<1x1x64xf32, #tpu.memory_space<vmem>>, vector<1x1x64xf32>
    %70 = vector.shape_cast %69 : vector<1x1x64xf32> to vector<1x64xf32>
    %71 = vector.broadcast %70 : vector<1x64xf32> to vector<16x64xf32>
    %72 = arith.addf %68, %71 : vector<16x64xf32>
    %c0_34 = arith.constant 0 : index
    %c0_35 = arith.constant 0 : index
    %c0_36 = arith.constant 0 : index
    %73 = vector.load %arg7[%c0_34, %c0_35, %c0_36] : memref<1x64x128xf32, #tpu.memory_space<vmem>>, vector<1x64x128xf32>
    %74 = vector.shape_cast %73 : vector<1x64x128xf32> to vector<64x128xf32>
    %cst_37 = arith.constant dense<0.000000e+00> : vector<16x128xf32>
    %75 = tpu.matmul %72, %74, %cst_37 {dimension_numbers = #tpu.dot_dimension_numbers<[1], [0], [0], [1], [0, 0, 1, 1], [], []>} : vector<16x64xf32>, vector<64x128xf32>, vector<16x128xf32> -> vector<16x128xf32>
    %c0_38 = arith.constant 0 : index
    %c0_39 = arith.constant 0 : index
    %c0_40 = arith.constant 0 : index
    %76 = vector.load %arg8[%c0_38, %c0_39, %c0_40] : memref<1x1x128xf32, #tpu.memory_space<vmem>>, vector<1x1x128xf32>
    %77 = vector.shape_cast %76 : vector<1x1x128xf32> to vector<1x128xf32>
    %78 = vector.broadcast %77 : vector<1x128xf32> to vector<16x128xf32>
    %79 = arith.addf %75, %78 : vector<16x128xf32>
    %c0_41 = arith.constant 0 : index
    %c0_42 = arith.constant 0 : index
    %c0_43 = arith.constant 0 : index
    %80 = vector.load %arg9[%c0_41, %c0_42, %c0_43] : memref<1x16x128xf32, #tpu.memory_space<vmem>>, vector<1x16x128xf32>
    %81 = vector.shape_cast %80 : vector<1x16x128xf32> to vector<16x128xf32>
    %82 = vector.shape_cast %79 : vector<16x128xf32> to vector<1x16x128xf32>
    tpu.vector_store %arg9[%c0_41, %c0_42, %c0_43], %82 {strides = array<i32>} : memref<1x16x128xf32, #tpu.memory_space<vmem>>, vector<1x16x128xf32>,
    return
  }
  func.func @transform_0(%arg0: i32, %arg1: i32) -> (i32, i32, i32) {
    %c0_i32 = arith.constant 0 : i32
    %c0_i32_0 = arith.constant 0 : i32
    return %arg0, %arg1, %c0_i32 : i32, i32, i32
  }
  func.func @transform_1(%arg0: i32, %arg1: i32) -> (i32, i32, i32) {
    %c0_i32 = arith.constant 0 : i32
    %c0_i32_0 = arith.constant 0 : i32
    %c0_i32_1 = arith.constant 0 : i32
    return %arg0, %c0_i32, %c0_i32_0 : i32, i32, i32
  }
  func.func @transform_2(%arg0: i32, %arg1: i32) -> (i32, i32, i32) {
    %c0_i32 = arith.constant 0 : i32
    %c0_i32_0 = arith.constant 0 : i32
    %c0_i32_1 = arith.constant 0 : i32
    return %arg0, %c0_i32, %c0_i32_0 : i32, i32, i32
  }
  func.func @transform_3(%arg0: i32, %arg1: i32) -> (i32, i32, i32) {
    %c0_i32 = arith.constant 0 : i32
    %c0_i32_0 = arith.constant 0 : i32
    %c0_i32_1 = arith.constant 0 : i32
    return %arg0, %c0_i32, %c0_i32_0 : i32, i32, i32
  }
  func.func @transform_4(%arg0: i32, %arg1: i32) -> (i32, i32, i32) {
    %c0_i32 = arith.constant 0 : i32
    %c0_i32_0 = arith.constant 0 : i32
    %c0_i32_1 = arith.constant 0 : i32
    return %arg0, %c0_i32, %c0_i32_0 : i32, i32, i32
  }
  func.func @transform_5(%arg0: i32, %arg1: i32) -> (i32, i32, i32) {
    %c0_i32 = arith.constant 0 : i32
    %c0_i32_0 = arith.constant 0 : i32
    %c0_i32_1 = arith.constant 0 : i32
    return %arg0, %c0_i32, %c0_i32_0 : i32, i32, i32
  }
  func.func @transform_6(%arg0: i32, %arg1: i32) -> (i32, i32, i32) {
    %c0_i32 = arith.constant 0 : i32
    %c0_i32_0 = arith.constant 0 : i32
    %c0_i32_1 = arith.constant 0 : i32
    return %arg0, %c0_i32, %c0_i32_0 : i32, i32, i32
  }
  func.func @transform_7(%arg0: i32, %arg1: i32) -> (i32, i32, i32) {
    %c0_i32 = arith.constant 0 : i32
    %c0_i32_0 = arith.constant 0 : i32
    return %arg0, %arg1, %c0_i32 : i32, i32, i32
  }
}

module attributes {stable_mosaic.version = 11 : i64} {
  func.func @_prediction_head_kernel(%arg0: i32, %arg1: i32, %arg2: memref<1x16x64xf32, #tpu.memory_space<vmem>>, %arg3: memref<1x64x64xf32, #tpu.memory_space<vmem>>, %arg4: memref<1x1x64xf32, #tpu.memory_space<vmem>>, %arg5: memref<1x1x64xf32, #tpu.memory_space<vmem>>, %arg6: memref<1x1x64xf32, #tpu.memory_space<vmem>>, %arg7: memref<1x64x128xf32, #tpu.memory_space<vmem>>, %arg8: memref<1x1x128xf32, #tpu.memory_space<vmem>>, %arg9: memref<1x16x128xf32, #tpu.memory_space<vmem>>) attributes {dimension_semantics = [#tpu.dimension_semantics<parallel>, #tpu.dimension_semantics<parallel>], iteration_bounds = array<i64: 2, 1>, scalar_prefetch = 0 : i64, scratch_operands = 0 : i64, tpu.core_type = #tpu.core_type<tc>, window_params = [{transform_indices = @transform_0, window_bounds = array<i64: 1, 16, 64>}, {transform_indices = @transform_1, window_bounds = array<i64: 1, 64, 64>}, {transform_indices = @transform_2, window_bounds = array<i64: 1, 1, 64>}, {transform_indices = @transform_3, window_bounds = array<i64: 1, 1, 64>}, {transform_indices = @transform_4, window_bounds = array<i64: 1, 1, 64>}, {transform_indices = @transform_5, window_bounds = array<i64: 1, 64, 128>}, {transform_indices = @transform_6, window_bounds = array<i64: 1, 1, 128>}, {transform_indices = @transform_7, window_bounds = array<i64: 1, 16, 128>}]} {
    %c0 = arith.constant 0 : index
    %c0_0 = arith.constant 0 : index
    %c0_1 = arith.constant 0 : index
    %0 = vector.load %arg2[%c0, %c0_0, %c0_1] : memref<1x16x64xf32, #tpu.memory_space<vmem>>, vector<1x16x64xf32>
    %1 = vector.shape_cast %0 : vector<1x16x64xf32> to vector<16x64xf32>
    %c0_2 = arith.constant 0 : index
    %c0_3 = arith.constant 0 : index
    %c0_4 = arith.constant 0 : index
    %2 = vector.load %arg3[%c0_2, %c0_3, %c0_4] : memref<1x64x64xf32, #tpu.memory_space<vmem>>, vector<1x64x64xf32>
    %3 = vector.shape_cast %2 : vector<1x64x64xf32> to vector<64x64xf32>
    %cst = arith.constant dense<0.000000e+00> : vector<16x64xf32>
    %4 = tpu.matmul %1, %3, %cst {dimension_numbers = #tpu.dot_dimension_numbers<[1], [0], [0], [1], [0, 0, 1, 1], [], []>} : vector<16x64xf32>, vector<64x64xf32>, vector<16x64xf32> -> vector<16x64xf32>
    %c0_5 = arith.constant 0 : index
    %c0_6 = arith.constant 0 : index
    %c0_7 = arith.constant 0 : index
    %5 = vector.load %arg4[%c0_5, %c0_6, %c0_7] : memref<1x1x64xf32, #tpu.memory_space<vmem>>, vector<1x1x64xf32>
    %6 = vector.shape_cast %5 : vector<1x1x64xf32> to vector<1x64xf32>
    %7 = vector.broadcast %6 : vector<1x64xf32> to vector<16x64xf32>
    %8 = arith.addf %4, %7 : vector<16x64xf32>
    %cst_8 = arith.constant 5.000000e-01 : f32
    %9 = vector.broadcast %cst_8 : f32 to vector<16x64xf32>
    %10 = arith.mulf %9, %8 : vector<16x64xf32>
    %cst_9 = arith.constant 0.707106769 : f32
    %11 = vector.broadcast %cst_9 : f32 to vector<16x64xf32>
    %12 = arith.mulf %8, %11 : vector<16x64xf32>
    %13 = math.absf %12 : vector<16x64xf32>
    %cst_10 = arith.constant 0.327591091 : f32
    %14 = vector.broadcast %cst_10 : f32 to vector<16x64xf32>
    %15 = arith.mulf %14, %13 : vector<16x64xf32>
    %cst_11 = arith.constant 1.000000e+00 : f32
    %16 = vector.broadcast %cst_11 : f32 to vector<16x64xf32>
    %17 = arith.addf %16, %15 : vector<16x64xf32>
    %cst_12 = arith.constant 1.000000e+00 : f32
    %18 = vector.broadcast %cst_12 : f32 to vector<16x64xf32>
    %19 = arith.divf %18, %17 : vector<16x64xf32>
    %cst_13 = arith.constant 1.06140542 : f32
    %20 = vector.broadcast %cst_13 : f32 to vector<16x64xf32>
    %21 = arith.mulf %20, %19 : vector<16x64xf32>
    %cst_14 = arith.constant -1.45315206 : f32
    %22 = vector.broadcast %cst_14 : f32 to vector<16x64xf32>
    %23 = arith.addf %21, %22 : vector<16x64xf32>
    %24 = arith.mulf %23, %19 : vector<16x64xf32>
    %cst_15 = arith.constant 1.42141378 : f32
    %25 = vector.broadcast %cst_15 : f32 to vector<16x64xf32>
    %26 = arith.addf %24, %25 : vector<16x64xf32>
    %27 = arith.mulf %26, %19 : vector<16x64xf32>
    %cst_16 = arith.constant -0.284496725 : f32
    %28 = vector.broadcast %cst_16 : f32 to vector<16x64xf32>
    %29 = arith.addf %27, %28 : vector<16x64xf32>
    %30 = arith.mulf %29, %19 : vector<16x64xf32>
    %cst_17 = arith.constant 0.254829586 : f32
    %31 = vector.broadcast %cst_17 : f32 to vector<16x64xf32>
    %32 = arith.addf %30, %31 : vector<16x64xf32>
    %33 = arith.mulf %32, %19 : vector<16x64xf32>
    %cst_18 = arith.constant 0.000000e+00 : f32
    %34 = vector.broadcast %cst_18 : f32 to vector<16x64xf32>
    %35 = arith.subf %34, %13 : vector<16x64xf32>
    %36 = arith.mulf %35, %13 : vector<16x64xf32>
    %37 = math.exp %36 : vector<16x64xf32>
    %38 = arith.mulf %33, %37 : vector<16x64xf32>
    %cst_19 = arith.constant 1.000000e+00 : f32
    %39 = vector.broadcast %cst_19 : f32 to vector<16x64xf32>
    %40 = arith.subf %39, %38 : vector<16x64xf32>
    %cst_20 = arith.constant 0.000000e+00 : f32
    %41 = vector.broadcast %cst_20 : f32 to vector<16x64xf32>
    %42 = arith.cmpf olt, %12, %41 : vector<16x64xf32>
    %cst_21 = arith.constant 0.000000e+00 : f32
    %43 = vector.broadcast %cst_21 : f32 to vector<16x64xf32>
    %44 = arith.subf %43, %40 : vector<16x64xf32>
    %45 = arith.select %42, %44, %40 : vector<16x64xi1>, vector<16x64xf32>
    %cst_22 = arith.constant 1.000000e+00 : f32
    %46 = vector.broadcast %cst_22 : f32 to vector<16x64xf32>
    %47 = arith.addf %46, %45 : vector<16x64xf32>
    %48 = arith.mulf %10, %47 : vector<16x64xf32>
    %cst_23 = arith.constant dense<0.000000e+00> : vector<16xf32>
    %49 = vector.multi_reduction <add>, %48, %cst_23 [1] : vector<16x64xf32> to vector<16xf32>
    %50 = vector.shape_cast %49 : vector<16xf32> to vector<16x1xf32>
    %cst_24 = arith.constant 6.400000e+01 : f32
    %51 = vector.broadcast %cst_24 : f32 to vector<16x1xf32>
    %52 = arith.divf %50, %51 : vector<16x1xf32>
    %53 = vector.broadcast %52 : vector<16x1xf32> to vector<16x64xf32>
    %54 = arith.subf %48, %53 : vector<16x64xf32>
    %55 = arith.mulf %54, %54 : vector<16x64xf32>
    %cst_25 = arith.constant dense<0.000000e+00> : vector<16xf32>
    %56 = vector.multi_reduction <add>, %55, %cst_25 [1] : vector<16x64xf32> to vector<16xf32>
    %57 = vector.shape_cast %56 : vector<16xf32> to vector<16x1xf32>
    %cst_26 = arith.constant 6.400000e+01 : f32
    %58 = vector.broadcast %cst_26 : f32 to vector<16x1xf32>
    %59 = arith.divf %57, %58 : vector<16x1xf32>
    %cst_27 = arith.constant 9.99999996E-13 : f32
    %60 = vector.broadcast %cst_27 : f32 to vector<16x1xf32>
    %61 = arith.addf %59, %60 : vector<16x1xf32>
    %62 = math.rsqrt %61 : vector<16x1xf32>
    %63 = vector.broadcast %62 : vector<16x1xf32> to vector<16x64xf32>
    %64 = arith.mulf %54, %63 : vector<16x64xf32>
    %c0_28 = arith.constant 0 : index
    %c0_29 = arith.constant 0 : index
    %c0_30 = arith.constant 0 : index
    %65 = vector.load %arg5[%c0_28, %c0_29, %c0_30] : memref<1x1x64xf32, #tpu.memory_space<vmem>>, vector<1x1x64xf32>
    %66 = vector.shape_cast %65 : vector<1x1x64xf32> to vector<1x64xf32>
    %67 = vector.broadcast %66 : vector<1x64xf32> to vector<16x64xf32>
    %68 = arith.mulf %67, %64 : vector<16x64xf32>
    %c0_31 = arith.constant 0 : index
    %c0_32 = arith.constant 0 : index
    %c0_33 = arith.constant 0 : index
    %69 = vector.load %arg6[%c0_31, %c0_32, %c0_33] : memref<1x1x64xf32, #tpu.memory_space<vmem>>, vector<1x1x64xf32>
    %70 = vector.shape_cast %69 : vector<1x1x64xf32> to vector<1x64xf32>
    %71 = vector.broadcast %70 : vector<1x64xf32> to vector<16x64xf32>
    %72 = arith.addf %68, %71 : vector<16x64xf32>
    %c0_34 = arith.constant 0 : index
    %c0_35 = arith.constant 0 : index
    %c0_36 = arith.constant 0 : index
    %73 = vector.load %arg7[%c0_34, %c0_35, %c0_36] : memref<1x64x128xf32, #tpu.memory_space<vmem>>, vector<1x64x128xf32>
    %74 = vector.shape_cast %73 : vector<1x64x128xf32> to vector<64x128xf32>
    %cst_37 = arith.constant dense<0.000000e+00> : vector<16x128xf32>
    %75 = tpu.matmul %72, %74, %cst_37 {dimension_numbers = #tpu.dot_dimension_numbers<[1], [0], [0], [1], [0, 0, 1, 1], [], []>} : vector<16x64xf32>, vector<64x128xf32>, vector<16x128xf32> -> vector<16x128xf32>
    %c0_38 = arith.constant 0 : index
    %c0_39 = arith.constant 0 : index
    %c0_40 = arith.constant 0 : index
    %76 = vector.load %arg8[%c0_38, %c0_39, %c0_40] : memref<1x1x128xf32, #tpu.memory_space<vmem>>, vector<1x1x128xf32>
    %77 = vector.shape_cast %76 : vector<1x1x128xf32> to vector<1x128xf32>
    %78 = vector.broadcast %77 : vector<1x128xf32> to vector<16x128xf32>
    %79 = arith.addf %75, %78 : vector<16x128xf32>
    %c0_41 = arith.constant 0 : index
    %c0_42 = arith.constant 0 : index
    %c0_43 = arith.constant 0 : index
    %80 = vector.load %arg9[%c0_41, %c0_42, %c0_43] : memref<1x16x128xf32, #tpu.memory_space<vmem>>, vector<1x16x128xf32>
    %81 = vector.shape_cast %80 : vector<1x16x128xf32> to vector<16x128xf32>
    %82 = vector.shape_cast %79 : vector<16x128xf32> to vector<1x16x128xf32>
    tpu.vector_store %arg9[%c0_41, %c0_42, %c0_43], %82 {strides = array<i32>} : memref<1x16x128xf32, #tpu.memory_space<vmem>>, vector<1x16x128xf32>,
    return
  }
  func.func @transform_0(%arg0: i32, %arg1: i32) -> (i32, i32, i32) {
    %c0_i32 = arith.constant 0 : i32
    %c0_i32_0 = arith.constant 0 : i32
    return %arg0, %arg1, %c0_i32 : i32, i32, i32
  }
  func.func @transform_1(%arg0: i32, %arg1: i32) -> (i32, i32, i32) {
    %c0_i32 = arith.constant 0 : i32
    %c0_i32_0 = arith.constant 0 : i32
    %c0_i32_1 = arith.constant 0 : i32
    return %arg0, %c0_i32, %c0_i32_0 : i32, i32, i32
  }
  func.func @transform_2(%arg0: i32, %arg1: i32) -> (i32, i32, i32) {
    %c0_i32 = arith.constant 0 : i32
    %c0_i32_0 = arith.constant 0 : i32
    %c0_i32_1 = arith.constant 0 : i32
    return %arg0, %c0_i32, %c0_i32_0 : i32, i32, i32
  }
  func.func @transform_3(%arg0: i32, %arg1: i32) -> (i32, i32, i32) {
    %c0_i32 = arith.constant 0 : i32
    %c0_i32_0 = arith.constant 0 : i32
    %c0_i32_1 = arith.constant 0 : i32
    return %arg0, %c0_i32, %c0_i32_0 : i32, i32, i32
  }
  func.func @transform_4(%arg0: i32, %arg1: i32) -> (i32, i32, i32) {
    %c0_i32 = arith.constant 0 : i32
    %c0_i32_0 = arith.constant 0 : i32
    %c0_i32_1 = arith.constant 0 : i32
    return %arg0, %c0_i32, %c0_i32_0 : i32, i32, i32
  }
  func.func @transform_5(%arg0: i32, %arg1: i32) -> (i32, i32, i32) {
    %c0_i32 = arith.constant 0 : i32
    %c0_i32_0 = arith.constant 0 : i32
    %c0_i32_1 = arith.constant 0 : i32
    return %arg0, %c0_i32, %c0_i32_0 : i32, i32, i32
  }
  func.func @transform_6(%arg0: i32, %arg1: i32) -> (i32, i32, i32) {
    %c0_i32 = arith.constant 0 : i32
    %c0_i32_0 = arith.constant 0 : i32
    %c0_i32_1 = arith.constant 0 : i32
    return %arg0, %c0_i32, %c0_i32_0 : i32, i32, i32
  }
  func.func @transform_7(%arg0: i32, %arg1: i32) -> (i32, i32, i32) {
    %c0_i32 = arith.constant 0 : i32
    %c0_i32_0 = arith.constant 0 : i32
    return %arg0, %arg1, %c0_i32 : i32, i32, i32
  }
}

</mosaic_0001>

<bundles_post_ra>
// kernel: tpu_custom_call.1
= control target key start
LH: loop header
LB: loop body
LE: loop exit
PB: predicated region body
PF: predicated region fallthrough
CT: control target
= control target key end

     0   :  { %12 = vsyncpa [#allocation3], 0  ;;  %s1621_s0 = inlined_call_operand.hbm [shape: f32[2,16,64], index: 0, kind: input, shape index: {}]   ;;  %s1622_s1 = inlined_call_operand.hbm [shape: f32[2,64,64], index: 1, kind: input, shape index: {}]   ;;  %s1623_s2 = inlined_call_operand.vmem [shape: f32[2,1,64], index: 2, kind: input, shape index: {}]   ;;  %s1624_s3 = inlined_call_operand.vmem [shape: f32[2,1,64], index: 3, kind: input, shape index: {}]   ;;  %s1625_s4 = inlined_call_operand.vmem [shape: f32[2,1,64], index: 4, kind: input, shape index: {}]   ;;  %s1626_s5 = inlined_call_operand.hbm [shape: f32[2,64,128], index: 5, kind: input, shape index: {}]   ;;  %s1627_s6 = inlined_call_operand.vmem [shape: f32[2,1,128], index: 6, kind: input, shape index: {}]   ;;  %s1628_s7 = inlined_call_operand.hbm [shape: f32[2,16,128], index: 7, kind: output, shape index: {}]  }
   0x1   :  { %14 = vsyncpa [#allocation3 + $0x1], 0 }
   0x2   :  { %15 = vsyncpa [#allocation6], 0 }
   0x3   :  { %16 = vsyncpa [#allocation4], 0 }
   0x4   :  { %18 = vsyncpa [#allocation4 + $0x1], 0  ;;  %s1326_s24 = smov 0   ;;  %s1328_s25 = smov 0  }
   0x5   :  { %s1330_s26 = smov 0   ;;  %s1332_s27 = smov 0  }
   0x6   :  { %s1334_s28 = smov 0   ;;  %s1336_s29 = smov 0  }
   0x7 LB: > { %s888_s30 = sadd.s32 4294967295, %s1276_s29   ;;  %s889_s8 = sadd.s32 4294967294, %s1276_s29   ;;  %s1276_s29 = sphi %s1336_s29, %s24_s29   ;;  %s1272_s28 = sphi %s1334_s28, %s1652_s28   ;;  %s1268_s27 = sphi %s1332_s27, %s1651_s27   ;;  %s1264_s26 = sphi %s1330_s26, %s1650_s26   ;;  %s1260_s25 = sphi %s1328_s25, %s1649_s25   ;;  %s1256_s24 = sphi %s1326_s24, %s1648_s24  }
   0x8   : > { %p58_p0 = scmp.ne.s32.totalorder %s1260_s25, %s1256_s24  ;;  %p59_p1 = scmp.eq.s32.totalorder %s888_s30, 0 }
   0x9   : > { %p1360_p2 = scmp.eq.s32.totalorder %s888_s30, 1  ;;  %p246_p3 = scmp.eq.s32.totalorder %s889_s8, 1 }
   0xa   : > { %p1364_p4 = por %p59_p1, %p58_p0  ;;  %p890_p5 = scmp.ge.s32.totalorder %s1276_s29, 1 }
   0xb   : > { %s1634_s9 = scalar_select %p1360_p2, 1, 0 }
   0xc   : > { %s1635_s10 = scalar_select %p1364_p4, 1, 0 }
   0xd   : > { %p1369_p6 = por %p246_p3, %p58_p0  ;;  %p253_p7 = scmp.lt.s32.totalorder %s1276_s29, 3 }
   0xe   : > { %s915_s12 = sshll.u32 %s1268_s27, 10  ;;  %s1278_s17 = smov [#allocation5]  }
   0xf   : > { %s1636_s11 = scalar_select %p1369_p6, 1, 0 }
  0x10   : > { %p1375_p8 = pnand %p890_p5, %p253_p7  ;;  %s1382_s16 = scalar_lea.hbm %s1622_s1, %s915_s12 }
  0x11   : > { %s268_s18 = sshll.u32 %s1278_s17, 4  ;;  %s1391_s21 = scalar_lea.hbm %s1626_s5, %s915_s12  ;;  %s1386_s18 = int_to_ptr.vmem [resolvable:$true] %s268_s18 }
  0x12   : > { %s1637_s13 = scalar_select %p1375_p8, 1, 0 }
  0x13   : > { %p1017_p9 = pneg %p1375_p8  ;;  %s1279_s23 = smov [#allocation7]  }
  0x14   : > { %s1400_s30 = sshll.u32 %s1279_s23, 4  ;;  %s1100_s8 = scalar_lea.hbm %s1382_s16, 1024  ;;  %s303_s30 = int_to_ptr.vmem [resolvable:$true] %s1400_s30 }
  0x15   : > { %p1395_p10 = pnand %p1017_p9, %p1364_p4  ;;  %p1101_p12 = scmp.ne.s32.totalorder %s1382_s16, %s1100_s8 }
  0x16   : > { %s1105_s15 = scalar_lea.hbm %s1622_s1, 2048  ;;  %p1106_p3 = scmp.lt.u32.totalorder %s1382_s16, %s1622_s1 }
  0x17   : > { %p1102_p13 = pneg %p1395_p10  ;;  %p1107_p5 = scmp.lt.u32.totalorder %s1105_s15, %s1100_s8 }
  0x18   : > { %p1109_p9 = scmp.lt.u32.totalorder %s1100_s8, %s1382_s16 }
  0x19   : > { %p1103_p0 = pnand %p1102_p13, %p1101_p12  ;;  %p1108_p7 = por %p1107_p5, %p1106_p3 }
  0x1b   : > { %p1104_p1 = pneg %p1103_p0  ;;  %p1110_p11 = por %p1109_p9, %p1108_p7 }
  0x1d   : > { %p1111_p6 = pnand %p1110_p11, %p1104_p1 }
  0x1f   : > { %1114 = shalt.err (!%p1111_p6)
}
  0x20   : > { %s1115_s20 = scalar_lea.vmem %s1386_s18, 1024  ;;  %p1123_p8 = scmp.lt.s32.totalorder %s1386_s18, %s1386_s18 }
  0x21   : > { %p1116_p12 = scmp.ne.s32.totalorder %s1386_s18, %s1115_s20  ;;  %p1124_p2 = scmp.lt.s32.totalorder %s1115_s20, %s1115_s20 }
  0x23   : > { %p1118_p0 = pnand %p1116_p12, %p1102_p13  ;;  %p1125_p3 = por %p1124_p2, %p1123_p8 }
  0x25   : > { %p1119_p4 = pneg %p1118_p0 }
  0x27   : > { %p1126_p5 = pnand %p1125_p3, %p1119_p4 }
  0x29   : > { %1129 = shalt.err (!%p1126_p5)
}
  0x2a   : > { %s1632_s23 = smov 128   ;;  %s1633_s8 = smov 8  }
  0x2b   : > { %1020 = dma.hbm_to_vmem [thread:$0]  (!%p1395_p10), %s1382_s16, 1024, %s1386_s18, [#allocation6], %s1632_s23, %s1632_s23, %s1633_s8  }
  0x2c   : > { %s1130_s12 = scalar_lea.hbm %s1391_s21, 1024  ;;  %s1135_s17 = scalar_lea.hbm %s1626_s5, 2048 }
  0x2d   : > { %p1131_p2 = scmp.ne.s32.totalorder %s1391_s21, %s1130_s12  ;;  %p1136_p8 = scmp.lt.u32.totalorder %s1391_s21, %s1626_s5 }
  0x2e   : > { %p1137_p11 = scmp.lt.u32.totalorder %s1135_s17, %s1130_s12  ;;  %p1139_p7 = scmp.lt.u32.totalorder %s1130_s12, %s1391_s21 }
  0x2f   : > { %p1133_p4 = pnand %p1131_p2, %p1102_p13 }
  0x30   : > { %p1138_p1 = por %p1137_p11, %p1136_p8 }
  0x31   : > { %p1134_p6 = pneg %p1133_p4 }
  0x32   : > { %p1140_p9 = por %p1139_p7, %p1138_p1 }
  0x34   : > { %p1141_p12 = pnand %p1140_p9, %p1134_p6 }
  0x36   : > { %1144 = shalt.err (!%p1141_p12)
}
  0x37   : > { %s1145_s16 = scalar_lea.vmem %s303_s30, 1024  ;;  %p1153_p2 = scmp.lt.s32.totalorder %s303_s30, %s303_s30 }
  0x38   : > { %p1146_p0 = scmp.ne.s32.totalorder %s303_s30, %s1145_s16  ;;  %p1154_p4 = scmp.lt.s32.totalorder %s1145_s16, %s1145_s16 }
  0x3a   : > { %p1148_p3 = pnand %p1146_p0, %p1102_p13  ;;  %p1155_p8 = por %p1154_p4, %p1153_p2 }
  0x3c   : > { %p1149_p5 = pneg %p1148_p3 }
  0x3e   : > { %p1156_p11 = pnand %p1155_p8, %p1149_p5 }
  0x40   : > { %1159 = shalt.err (!%p1156_p11)
}
  0x41   : > { %1023 = dma.hbm_to_vmem [thread:$0]  (!%p1395_p10), %s1391_s21, 1024, %s303_s30, [#allocation6], %s1632_s23, %s1632_s23, %s1633_s8  }
  0x42   : > { %s36_s18 = sadd.s32 1, %s1272_s28  ;;  %s45_s12 = sadd.s32 1, %s1264_s26 }
  0x43   : > { %p38_p13 = scmp.ge.s32.totalorder %s36_s18, 2  ;;  %p52_p6 = scmp.ne.s32.totalorder %s1264_s26, %s1260_s25 }
  0x44   : > { %p53_p1 = scmp.eq.s32.totalorder %s1276_s29, 0  ;;  %p1032_p7 = scmp.lt.s32.totalorder %s1276_s29, 2 }
  0x45   : > { %s1654_s18 = smov (%p38_p13, %s36_s18), 0  ;;  %p1639_p12 = scmp.ne.s32.totalorder %s1634_s9, 0 }
  0x46   : > { %p54_p9 = por %p53_p1, %p52_p6  ;;  %s40_s14 = ssub.s32 %s1272_s28, %s1654_s18 }
  0x47   : > { %p1464_p0 = por %p1639_p12, %p52_p6  ;;  %s322_s15 = sand.u32 1, %s1264_s26  }
  0x48   : > { %p43_p3 = scmp.eq.s32.totalorder %s40_s14, 0  ;;  %s896_s21 = sshll.u32 %s322_s15, 4 }
  0x49   : > { %s917_s30 = sshll.u32 %s1272_s28, 8  ;;  %s326_s9 = scalar_lea.vmem [#allocation2], %s896_s21 }
  0x4a   : > { %s1473_s17 = scalar_select %p43_p3, %s1264_s26, %s45_s12  }
  0x4b   : > { %s1478_s16 = scalar_lea.hbm %s1621_s0, %s917_s30  ;;  %s335_s23 = sshll.u32 %s326_s9, 4  ;;  %s1486_s23 = int_to_ptr.vmem [resolvable:$true] %s335_s23 }
  0x4c   : > { %p1482_p10 = pnand %p1032_p7, %p54_p9  ;;  %s1488_s12 = scalar_lea.sflag [#allocation3], %s322_s15 }
  0x4d   : > { %s1160_s14 = scalar_lea.hbm %s1478_s16, 256  ;;  %s1165_s19 = scalar_lea.hbm %s1621_s0, 512 }
  0x4e   : > { %p1161_p5 = scmp.ne.s32.totalorder %s1478_s16, %s1160_s14  ;;  %p1162_p2 = pneg %p1482_p10 }
  0x4f   : > { %p1166_p11 = scmp.lt.u32.totalorder %s1478_s16, %s1621_s0  ;;  %p1167_p13 = scmp.lt.u32.totalorder %s1165_s19, %s1160_s14 }
  0x50   : > { %p1163_p4 = pnand %p1162_p2, %p1161_p5  ;;  %p1169_p1 = scmp.lt.u32.totalorder %s1160_s14, %s1478_s16 }
  0x51   : > { %p1168_p6 = por %p1167_p13, %p1166_p11 }
  0x52   : > { %p1164_p8 = pneg %p1163_p4 }
  0x53   : > { %p1170_p7 = por %p1169_p1, %p1168_p6 }
  0x55   : > { %p1171_p9 = pnand %p1170_p7, %p1164_p8 }
  0x57   : > { %1174 = shalt.err (!%p1171_p9)
}
  0x58   : > { %s1175_s15 = scalar_lea.vmem %s1486_s23, 256  ;;  %s1282_s21 = smov [#allocation2]  }
  0x59   : > { %p1176_p12 = scmp.ne.s32.totalorder %s1486_s23, %s1175_s15  ;;  %s1180_s30 = sshll.u32 %s1282_s21, 4  ;;  %s1181_s30 = int_to_ptr.vmem [resolvable:$false] %s1180_s30 }
  0x5a   : > { %s1182_s20 = scalar_lea.vmem %s1181_s30, 512  ;;  %p1183_p4 = scmp.lt.s32.totalorder %s1486_s23, %s1181_s30 }
  0x5b   : > { %p1178_p3 = pnand %p1176_p12, %p1162_p2  ;;  %p1184_p11 = scmp.lt.s32.totalorder %s1182_s20, %s1175_s15 }
  0x5d   : > { %p1179_p5 = pneg %p1178_p3  ;;  %p1185_p13 = por %p1184_p11, %p1183_p4 }
  0x5f   : > { %p1186_p6 = pnand %p1185_p13, %p1179_p5 }
  0x61   : > { %1189 = shalt.err (!%p1186_p6)
}
  0x62   : > { %s1642_s14 = smov 8   ;;  %s1643_s19 = smov 128  }
  0x63   : > { %1027 = dma.hbm_to_vmem [thread:$0]  (!%p1482_p10), %s1478_s16, 256, %s1486_s23, %s1488_s12, %s1643_s19, %s1643_s19, %s1642_s14  }
  0x64   : > { %p1644_p2 = scmp.ne.s32.totalorder %s1637_s13, 0 }
  0x65   : > { %s1522_s9 = sand.u32 (!%p1644_p2), 1, %s1260_s25   ;;  %p1645_p8 = scmp.ne.s32.totalorder (!%p1644_p2), %s1635_s10, 0 }
  0x66   : > { %347 = sbr.rel (%p1644_p2) target bundleno = 941 (0x3ad), region = 48  ;;  %s900_s15 = sshll.u32 (!%p1644_p2), %s1522_s9, 4 }
  0x67   : > { %s350_s21 = scalar_lea.sflag (!%p1644_p2), [#allocation3], %s1522_s9  ;;  %s353_s8 = scalar_lea.vmem (!%p1644_p2), [#allocation2], %s900_s15 }
  0x6d   : > { %1243 = dma.done.wait (%p1645_p8), %s350_s21, 256  }
  0x6e   : > { %1245 = vsyncadd (%p1645_p8), %s350_s21, 4294967040 }
  0x6f   : > { %1247 = dma.done.wait (%p1645_p8), [#allocation6], 2048  }
  0x70   : > { %1249 = vsyncadd (%p1645_p8), [#allocation6], 4294965248  ;;  %v420_v0 = vld [vmem:[#allocation5] sm:$0xff]  ;;  %v421_v1 = vld [vmem:[#allocation5 + $0x8] sm:$0xff]  ;;  %vm435_vm0 = vcmask 523264   ;;  %p405_p10 = scmp.lt.s32.totalorder %s1268_s27, 1 }
  0x71   : > { %v422_v2 = vld [vmem:[#allocation5 + $0x10] sm:$0xff]  ;;  %v977_v3 = vpack.c.bf16 %v421_v1, %v420_v0  ;;  %v423_v4 = vld [vmem:[#allocation5 + $0x18] sm:$0xff]  ;;  %v424_v6 = vld [vmem:[#allocation5 + $0x20] sm:$0xff]  ;;  %s918_s30 = sshll.u32 %s1268_s27, 8 }
  0x72   : > { %v981_v5 = vpack.c.bf16 %v423_v4, %v422_v2  ;;  %v425_v7 = vld [vmem:[#allocation5 + $0x28] sm:$0xff]  ;;  %v418_v8 = vld [vmem:[%s353_s8] sm:$0xff]  ;;  %v427_v11 = vld [vmem:[#allocation5 + $0x38] sm:$0xff]  ;;  %s1540_s10 = scalar_select %p405_p10, %s1268_s27, 1 }
  0x73   : > { %978 = vmatprep.subr.bf16.mxu0 %v977_v3  ;;  %955 = vmatprep.mubr.msk.f32.mxu0 %vm435_vm0, %v418_v8  ;;  %v985_v9 = vpack.c.bf16 %v425_v7, %v424_v6  ;;  %v426_v10 = vld [vmem:[#allocation5 + $0x30] sm:$0xff]  ;;  %v419_v13 = vld [vmem:[%s353_s8 + $0x8] sm:$0xff]  ;;  %s1572_s19 = scalar_lea.hbm %s1628_s7, %s918_s30  ;;  %s1283_s27 = smov [#allocation8]  }
  0x74   : > { %980 = vmatpush3.bf16.msra.mxu0 %v977_v3  ;;  %v989_v12 = vpack.c.bf16 %v427_v11, %v426_v10  ;;  %s407_s16 = scalar_lea.vmem %s1623_s2, %s1540_s10  ;;  %s410_s20 = scalar_lea.vmem %s1624_s3, %s1540_s10 }
  0x75   : > { %982 = vmatprep.subr.bf16.mxu0 %v981_v5  ;;  %v902_v14 = vld [vmem:[%s407_s16] ss:$0 sm:$0xff]  ;;  %s413_s21 = scalar_lea.vmem %s1625_s4, %s1540_s10  ;;  %s416_s23 = scalar_lea.vmem %s1627_s6, %s1540_s10 }
  0x76   : > { %s403_s16 = scalar_lea.vmem [#allocation8], %s900_s15  ;;  %s715_s15 = scalar_lea.sflag [#allocation4], %s1522_s9 }
  0x77   : > { %s730_s12 = sshll.u32 %s403_s16, 4  ;;  %s1567_s12 = int_to_ptr.vmem [resolvable:$true] %s730_s12 }
  0x78   : > { %984 = vmatpush3.bf16.msra.mxu0 %v981_v5  ;;  %s1190_s10 = scalar_lea.vmem %s1567_s12, 256 }
  0x79   : > { %986 = vmatprep.subr.bf16.mxu0 %v985_v9  ;;  %p1191_p1 = scmp.ne.s32.totalorder %s1567_s12, %s1190_s10 }
  0x7b   : > { %p1192_p7 = pnand %p1191_p1, %p1464_p0 }
  0x7c   : > { %988 = vmatpush3.bf16.msra.mxu0 %v985_v9 }
  0x7d   : > { %990 = vmatprep.subr.bf16.mxu0 %v989_v12  ;;  %p1193_p9 = pneg %p1192_p7 }
  0x80   : > { %992 = vmatpush3.bf16.msra.mxu0 %v989_v12 }
  0x83   : > { %956 = vmatmul.mubr.msk.f32.vlgmr.msra.gmra.mrb[0].mxu0 %vm435_vm0, %v419_v13 }
 0x156   : > { %v957_v15 = vpop.f32.mrb[0].mxu0 }
 0x157   : > { %v514_v16 = vadd.f32 %v957_v15, %v902_v14  ;;  %v508_v17 = vpop.f32.mrb[1].mxu0 }
 0x158   : > { %v509_v18 = vadd.f32 %v902_v14, %v508_v17  ;;  %v616_v17 = vld [vmem:[#allocation7] sm:$0xff] }
 0x159   : > { %v520_v19 = vmul.f32 0.70710677, %v514_v16  ;;  %v518_v2 = vmul.f32 0.5, %v514_v16 }
 0x15a   : > { %v519_v20 = vmul.f32 0.70710677, %v509_v18  ;;  %v517_v63 = vmul.f32 0.5, %v509_v18  ;;  %v617_v18 = vld [vmem:[#allocation7 + $0x8] sm:$0xff] }
 0x15b   : > { %v522_v21 = vand.u32 2147483647, %v520_v19  ;;  %vm562_vm1 = vcmp.lt.f32.partialorder %v520_v19, 0.0  ;;  %v993_v19 = vpack.c.bf16 %v617_v18, %v616_v17 }
 0x15c   : > { %v521_v22 = vand.u32 2147483647, %v519_v20  ;;  %vm561_vm2 = vcmp.lt.f32.partialorder %v519_v20, 0.0  ;;  %v618_v20 = vld [vmem:[#allocation7 + $0x10] sm:$0xff] }
 0x15d   : > { %v524_v23 = vmul.f32 0.3275911, %v522_v21  ;;  %v550_v27 = vsub.f32 0.0, %v522_v21  ;;  %994 = vmatprep.subr.bf16.mxu1 %v993_v19 }
 0x15e   : > { %v523_v24 = vmul.f32 0.3275911, %v521_v22  ;;  %v549_v28 = vsub.f32 0.0, %v521_v22  ;;  %996 = vmatpush3.bf16.msra.mxu1 %v993_v19 }
 0x15f   : > { %v526_v25 = vadd.f32 1.0, %v524_v23  ;;  %v552_v30 = vmul.f32 %v550_v27, %v522_v21  ;;  %v619_v21 = vld [vmem:[#allocation7 + $0x18] sm:$0xff] }
 0x160   : > { %v525_v26 = vadd.f32 1.0, %v523_v24  ;;  %v551_v32 = vmul.f32 %v549_v28, %v521_v22  ;;  %v620_v22 = vld [vmem:[#allocation7 + $0x20] sm:$0xff]  ;;  %v997_v23 = vpack.c.bf16 %v619_v21, %v618_v20  ;;  %v621_v24 = vld [vmem:[#allocation7 + $0x28] sm:$0xff]  ;;  %v623_v27 = vld [vmem:[#allocation7 + $0x38] sm:$0xff] }
 0x161   : > { %1088 = vrcp.f32 %v526_v25  ;;  %v555_v36 = vmul.f32 1.442695, %v552_v30  ;;  %v1001_v25 = vpack.c.bf16 %v621_v24, %v620_v22 }
 0x162   : > { %1090 = vrcp.f32 %v525_v26  ;;  %v553_v38 = vmul.f32 1.442695, %v551_v32  ;;  %998 = vmatprep.subr.bf16.mxu1 %v997_v23  ;;  %v622_v26 = vld [vmem:[#allocation7 + $0x30] sm:$0xff] }
 0x163   : > { %1092 = vpow2.f32 %v555_v36  ;;  %1000 = vmatpush3.bf16.msra.mxu1 %v997_v23  ;;  %v1005_v28 = vpack.c.bf16 %v623_v27, %v622_v26  ;;  %v905_v36 = vld [vmem:[%s410_s20] ss:$0 sm:$0xff] }
 0x164   : > { %1094 = vpow2.f32 %v553_v38  ;;  %1002 = vmatprep.subr.bf16.mxu1 %v1001_v25  ;;  %v906_v38 = vld [vmem:[%s413_s21] ss:$0 sm:$0xff]  ;;  %s1194_s21 = sshll.u32 %s1283_s27, 4  ;;  %s1195_s21 = int_to_ptr.vmem [resolvable:$false] %s1194_s21 }
 0x165   : > { %s1196_s8 = scalar_lea.vmem %s1195_s21, 512  ;;  %p1197_p12 = scmp.lt.s32.totalorder %s1567_s12, %s1195_s21 }
 0x166   : > { %p1198_p3 = scmp.lt.s32.totalorder %s1196_s8, %s1190_s10 }
 0x167   : > { %1004 = vmatpush3.bf16.msra.mxu1 %v1001_v25 }
 0x168   : > { %1006 = vmatprep.subr.bf16.mxu1 %v1005_v28  ;;  %p1199_p5 = por %p1198_p3, %p1197_p12 }
 0x16a   : > { %p1200_p4 = pnand %p1199_p5, %p1193_p9 }
 0x16b   : > { %v1089_v29 = vpop.eup %1088  ;;  %1008 = vmatpush3.bf16.msra.mxu1 %v1005_v28 }
 0x16c   : > { %v1091_v31 = vpop.eup %1090  ;;  %v532_v33 = vmul.f32 1.0614054, %v1089_v29 }
 0x16d   : > { %v531_v34 = vmul.f32 1.0614054, %v1091_v31  ;;  %v1093_v52 = vpop.eup %1092 }
 0x16e   : > { %v534_v35 = vadd.f32 -1.4531521, %v532_v33  ;;  %v1095_v54 = vpop.eup %1094 }
 0x16f   : > { %v533_v37 = vadd.f32 -1.4531521, %v531_v34 }
 0x170   : > { %v536_v39 = vmul.f32 %v1089_v29, %v534_v35 }
 0x171   : > { %v535_v40 = vmul.f32 %v1091_v31, %v533_v37 }
 0x172   : > { %v538_v41 = vadd.f32 1.4214138, %v536_v39 }
 0x173   : > { %v537_v42 = vadd.f32 1.4214138, %v535_v40 }
 0x174   : > { %v540_v43 = vmul.f32 %v1089_v29, %v538_v41 }
 0x175   : > { %v539_v44 = vmul.f32 %v1091_v31, %v537_v42 }
 0x176   : > { %v542_v45 = vadd.f32 -0.28449672, %v540_v43 }
 0x177   : > { %v541_v46 = vadd.f32 -0.28449672, %v539_v44 }
 0x178   : > { %v544_v47 = vmul.f32 %v1089_v29, %v542_v45  ;;  %v907_v45 = vld [vmem:[%s416_s23] ss:$0 sm:$0xff] }
 0x179   : > { %v543_v48 = vmul.f32 %v1091_v31, %v541_v46 }
 0x17a   : > { %v546_v49 = vadd.f32 0.2548296, %v544_v47 }
 0x17b   : > { %v545_v50 = vadd.f32 0.2548296, %v543_v48 }
 0x17c   : > { %v548_v51 = vmul.f32 %v1089_v29, %v546_v49 }
 0x17d   : > { %v547_v53 = vmul.f32 %v1091_v31, %v545_v50 }
 0x17e   : > { %v558_v55 = vmul.f32 %v1093_v52, %v548_v51 }
 0x17f   : > { %v557_v56 = vmul.f32 %v1095_v54, %v547_v53 }
 0x180   : > { %v560_v57 = vsub.f32 1.0, %v558_v55 }
 0x181   : > { %v559_v58 = vsub.f32 1.0, %v557_v56 }
 0x182   : > { %v564_v59 = vsub.f32 0.0, %v560_v57 }
 0x183   : > { %v563_v60 = vsub.f32 0.0, %v559_v58 }
 0x184   : > { %v566_v61 = vsel %vm562_vm1, %v564_v59, %v560_v57 }
 0x185   : > { %v565_v62 = vsel %vm561_vm2, %v563_v60, %v559_v58  ;;  %v568_v1 = vadd.f32 1.0, %v566_v61 }
 0x186   : > { %v567_v0 = vadd.f32 1.0, %v565_v62 }
 0x187   : > { %v570_v5 = vmul.f32 %v568_v1, %v518_v2 }
 0x188   : > { %v569_v3 = vmul.f32 %v567_v0, %v517_v63 }
 0x189   : > { %v574_v6 = vsel %vm435_vm0, %v570_v5, 0.0 }
 0x18a   : > { %v571_v4 = vsel %vm435_vm0, %v569_v3, 0.0 }
 0x18b   : > { %572 = vadd.xlane.f32.xlu0 %v571_v4 }
 0x18f   : > { %575 = vadd.xlane.f32.xlu0 %v574_v6 }
 0x218   : > { %v573_v7 = vpop.xlane.xlu0 %572 }
 0x219   : > { %v578_v8 = vmul.f32 0.015625, %v573_v7 }
 0x21b   : > { %v580_v9 = vsub.f32 %v569_v3, %v578_v8 }
 0x21c   : > { %v576_v10 = vpop.xlane.xlu0 %575 }
 0x21d   : > { %v579_v11 = vmul.f32 0.015625, %v576_v10  ;;  %v582_v12 = vmul.f32 %v580_v9, %v580_v9 }
 0x21f   : > { %v581_v13 = vsub.f32 %v570_v5, %v579_v11  ;;  %v584_v14 = vsel %vm435_vm0, %v582_v12, 0.0 }
 0x220   : > { %585 = vadd.xlane.f32.xlu1 %v584_v14 }
 0x221   : > { %v583_v15 = vmul.f32 %v581_v13, %v581_v13 }
 0x223   : > { %v587_v16 = vsel %vm435_vm0, %v583_v15, 0.0 }
 0x224   : > { %588 = vadd.xlane.f32.xlu1 %v587_v16 }
 0x2ad   : > { %v586_v29 = vpop.xlane.xlu1 %585 }
 0x2ae   : > { %v590_v30 = vmul.f32 0.015625, %v586_v29 }
 0x2b0   : > { %v592_v31 = vadd.f32 1e-12, %v590_v30 }
 0x2b1   : > { %v589_v32 = vpop.xlane.xlu1 %588 }
 0x2b2   : > { %1096 = vrsqrt.f32 %v592_v31  ;;  %v591_v33 = vmul.f32 0.015625, %v589_v32 }
 0x2b4   : > { %v593_v34 = vadd.f32 1e-12, %v591_v33 }
 0x2b6   : > { %1098 = vrsqrt.f32 %v593_v34 }
 0x2bc   : > { %v1097_v35 = vpop.eup %1096 }
 0x2bd   : > { %v596_v37 = vmul.f32 %v1097_v35, %v580_v9 }
 0x2bf   : > { %v605_v39 = vmul.f32 %v905_v36, %v596_v37 }
 0x2c0   : > { %v1099_v40 = vpop.eup %1098 }
 0x2c1   : > { %v597_v41 = vmul.f32 %v1099_v40, %v581_v13  ;;  %v614_v42 = vadd.f32 %v906_v38, %v605_v39 }
 0x2c3   : > { %v606_v43 = vmul.f32 %v905_v36, %v597_v41  ;;  %974 = vmatprep.mubr.msk.f32.mxu1 %vm435_vm0, %v614_v42 }
 0x2c5   : > { %v615_v44 = vadd.f32 %v906_v38, %v606_v43 }
 0x2c7   : > { %975 = vmatmul.mubr.msk.f32.vlgmr.msra.gmra.mrb[0].mxu1 %vm435_vm0, %v615_v44 }
 0x39a   : > { %v976_v46 = vpop.f32.mrb[0].mxu1 }
 0x39b   : > { %v709_v47 = vadd.f32 %v976_v46, %v907_v45  ;;  %v703_v48 = vpop.f32.mrb[1].mxu1 }
 0x39c   : > { %v704_v49 = vadd.f32 %v907_v45, %v703_v48 }
 0x39d   : > { %713 = vst [vmem:[%s403_s16 + $0x8] sm:$0xff] %v709_v47 }
 0x39e   : > { %712 = vst [vmem:[%s403_s16] sm:$0xff] %v704_v49 }
 0x39f   : > { %1203 = shalt.err (!%p1200_p4)
}
 0x3a0   : > { %s1204_s13 = scalar_lea.hbm %s1572_s19, 256  ;;  %s1208_s30 = scalar_lea.hbm %s1628_s7, 512 }
 0x3a1   : > { %p1205_p11 = scmp.ne.s32.totalorder %s1572_s19, %s1204_s13  ;;  %p1209_p2 = scmp.lt.u32.totalorder %s1572_s19, %s1628_s7 }
 0x3a2   : > { %p1210_p8 = scmp.lt.u32.totalorder %s1208_s30, %s1204_s13  ;;  %p1212_p1 = scmp.lt.u32.totalorder %s1204_s13, %s1572_s19 }
 0x3a3   : > { %p1206_p13 = pnand %p1205_p11, %p1464_p0 }
 0x3a4   : > { %p1211_p10 = por %p1210_p8, %p1209_p2 }
 0x3a5   : > { %p1207_p6 = pneg %p1206_p13 }
 0x3a6   : > { %p1213_p7 = por %p1212_p1, %p1211_p10 }
 0x3a8   : > { %p1214_p9 = pnand %p1213_p7, %p1207_p6 }
 0x3aa   : > { %1217 = shalt.err (!%p1214_p9)
}
 0x3ab   : > { %s1284_s10 = smov 128   ;;  %s1285_s27 = smov 8  }
 0x3ac   : > { %1015 = dma.vmem_to_hbm [thread:$0]  (%p1464_p0), %s1567_s12, 256, %s1572_s19, %s715_s15, %s1284_s10, %s1284_s10, %s1285_s27  }
 0x3ad PF: > { %s745_s21 = sand.u32 1, %s1256_s24   ;;  %p1646_p12 = scmp.ne.s32.totalorder %s1636_s11, 0 }
 0x3ae   : > { %p1647_p3 = scmp.ge.s32.totalorder %s1276_s29, 2  ;;  %s746_s8 = scalar_lea.sflag [#allocation4], %s745_s21 }
 0x3b0   : > { %p1029_p5 = pnand %p1647_p3, %p1646_p12 }
 0x3b2   : > { %1251 = dma.done.wait (!%p1029_p5), %s746_s8, 256  }
 0x3b3   : > { %1253 = vsyncadd (!%p1029_p5), %s746_s8, 4294967040  ;;  %s24_s29 = sadd.s32 1, %s1276_s29   ;;  %s1648_s24 = smov %s1260_s25 }
 0x3b4   : > { %p21_p4 = scmp.ge.s32.totalorder %s24_s29, 4   ;;  %s1649_s25 = smov %s1264_s26 }
 0x3b5   : > { %s1650_s26 = smov %s1473_s17  ;;  %s1651_s27 = smov %s1272_s28 }
 0x3b6   : > { %s1652_s28 = smov %s1654_s18  ;;  %23 = sbr.rel (!%p21_p4) target bundleno = 7 (0x7), region = 115 }
 0x3bd   :  { %751 = vsyncpa [#allocation3], 1 }
 0x3be   :  { %753 = vsyncpa [#allocation3 + $0x1], 1 }
 0x3bf   :  { %754 = vsyncpa [#allocation6], 1 }
 0x3c0   :  { %755 = vsyncpa [#allocation4], 1 }
 0x3c1   :  { %757 = vsyncpa [#allocation4 + $0x1], 1 }

// kernel: tpu_custom_call.1
= control target key start
LH: loop header
LB: loop body
LE: loop exit
PB: predicated region body
PF: predicated region fallthrough
CT: control target
= control target key end

     0   :  { %s1681_s0 = inlined_call_operand.hbm [shape: f32[2,16,64], index: 0, kind: input, shape index: {}]   ;;  %s1682_s1 = inlined_call_operand.hbm [shape: f32[2,64,64], index: 1, kind: input, shape index: {}]   ;;  %s1683_s2 = inlined_call_operand.vmem [shape: f32[2,1,64], index: 2, kind: input, shape index: {}]   ;;  %s1684_s3 = inlined_call_operand.vmem [shape: f32[2,1,64], index: 3, kind: input, shape index: {}]   ;;  %s1685_s4 = inlined_call_operand.vmem [shape: f32[2,1,64], index: 4, kind: input, shape index: {}]   ;;  %s1686_s5 = inlined_call_operand.hbm [shape: f32[2,64,128], index: 5, kind: input, shape index: {}]   ;;  %s1687_s6 = inlined_call_operand.vmem [shape: f32[2,1,128], index: 6, kind: input, shape index: {}]   ;;  %s1688_s7 = inlined_call_operand.hbm [shape: f32[2,16,128], index: 7, kind: output, shape index: {}]  }
   0x1   :  { %1702 = sst [smem:[#allocation18_spill]] %s1682_s1 }
   0x2   :  { %1703 = sst [smem:[#allocation19_spill]] %s1688_s7 }
   0x3   :  { %12 = vsyncpa [#allocation3], 0 }
   0x4   :  { %14 = vsyncpa [#allocation3 + $0x1], 0 }
   0x5   :  { %15 = vsyncpa [#allocation6], 0 }
   0x6   :  { %17 = vsyncpa [#allocation6 + $0x1], 0 }
   0x7   :  { %18 = vsyncpa [#allocation4], 0 }
   0x8   :  { %20 = vsyncpa [#allocation4 + $0x1], 0  ;;  %s1367_s24 = smov 0   ;;  %s1369_s25 = smov 0  }
   0x9   :  { %s1371_s26 = smov 0   ;;  %s1373_s27 = smov 0  }
   0xa   :  { %s1375_s28 = smov 0   ;;  %s1377_s29 = smov 0  }
   0xb LB: > { %1704 = sst [smem:[#allocation12_spill]] %s1297_s24  ;;  %s1398_s30 = sadd.s32 4294967295, %s1317_s29   ;;  %s1317_s29 = sphi %s1377_s29, %s26_s29   ;;  %s1313_s28 = sphi %s1375_s28, %s1736_s28   ;;  %s1309_s27 = sphi %s1373_s27, %s1735_s27   ;;  %s1305_s26 = sphi %s1371_s26, %s1731_s26   ;;  %s1301_s25 = sphi %s1369_s25, %s1734_s25   ;;  %s1297_s24 = sphi %s1367_s24, %s1733_s24  }
   0xc   : > { %1705 = sst [smem:[#allocation13_spill]] %s1305_s26  ;;  %s929_s8 = sadd.s32 4294967294, %s1317_s29  }
   0xd   : > { %s38_s9 = sadd.s32 1, %s1313_s28  ;;  %s47_s10 = sadd.s32 1, %s1305_s26 }
   0xe   : > { %p40_p0 = scmp.ge.s32.totalorder %s38_s9, 2  ;;  %p54_p1 = scmp.ne.s32.totalorder %s1305_s26, %s1301_s25 }
   0xf   : > { %p55_p2 = scmp.eq.s32.totalorder %s1317_s29, 0  ;;  %p60_p3 = scmp.ne.s32.totalorder %s1301_s25, %s1297_s24 }
  0x10   : > { %s1738_s9 = smov (%p40_p0, %s38_s9), 0  ;;  %p61_p5 = scmp.eq.s32.totalorder %s1398_s30, 0 }
  0x11   : > { %1706 = sst [smem:[#allocation14_spill]] %s1738_s9  ;;  %p1410_p4 = por %p55_p2, %p54_p1 }
  0x12   : > { %s42_s12 = ssub.s32 %s1313_s28, %s1738_s9  ;;  %p242_p6 = scmp.eq.s32.totalorder %s1398_s30, 1 }
  0x13   : > { %p45_p7 = scmp.eq.s32.totalorder %s42_s12, 0  ;;  %p1418_p8 = por %p61_p5, %p60_p3 }
  0x14   : > { %p1422_p9 = por %p242_p6, %p54_p1  ;;  %p248_p10 = scmp.eq.s32.totalorder %s929_s8, 1 }
  0x15   : > { %s1708_s13 = scalar_select %p1418_p8, 1, 0 }
  0x16   : > { %s1709_s14 = scalar_select %p1422_p9, 1, 0 }
  0x17   : > { %s1427_s15 = scalar_select %p45_p7, %s1305_s26, %s47_s10  }
  0x18   : > { %1710 = sst [smem:[#allocation15_spill]] %s1709_s14  ;;  %p1429_p11 = por %p248_p10, %p60_p3 }
  0x19   : > { %1711 = sst [smem:[#allocation16_spill]] %s1427_s15  ;;  %p1075_p13 = scmp.lt.s32.totalorder %s1317_s29, 2 }
  0x1a   : > { %s1712_s16 = scalar_select %p1429_p11, 1, 0 }
  0x1b   : > { %s1436_s17 = sand.u32 1, %s1305_s26   ;;  %p1440_p0 = pnand %p1075_p13, %p1410_p4 }
  0x1c   : > { %1713 = sst [smem:[#allocation17_spill]] %s1712_s16  ;;  %s291_s19 = sand.u32 1, %s1317_s29  }
  0x1d   : > { %s1690_s20 = sshll.u32 %s1436_s17, 6  ;;  %s1691_s21 = sshll.u32 %s1313_s28, 10 }
  0x1e   : > { %s295_s22 = scalar_lea.vmem [#allocation5], %s1690_s20  ;;  %s1715_s1 = sld [smem:[#allocation18_spill]] }
  0x1f   : > { %s302_s23 = sshll.u32 %s295_s22, 4  ;;  %s1458_s11 = scalar_lea.sflag [#allocation6], %s291_s19  ;;  %s1456_s23 = int_to_ptr.vmem [resolvable:$true] %s302_s23 }
  0x20   : > { %p1464_p2 = pneg %p1440_p0 }
  0x24   : > { %s1454_s12 = scalar_lea.hbm %s1715_s1, %s1691_s21  ;;  %s1146_s10 = scalar_lea.hbm %s1715_s1, 2048 }
  0x25   : > { %s1141_s9 = scalar_lea.hbm %s1454_s12, 1024  ;;  %p1147_p5 = scmp.lt.u32.totalorder %s1454_s12, %s1715_s1 }
  0x26   : > { %p1142_p1 = scmp.ne.s32.totalorder %s1454_s12, %s1141_s9  ;;  %p1148_p6 = scmp.lt.u32.totalorder %s1146_s10, %s1141_s9 }
  0x27   : > { %p1150_p10 = scmp.lt.u32.totalorder %s1141_s9, %s1454_s12 }
  0x28   : > { %p1144_p3 = pnand %p1464_p2, %p1142_p1  ;;  %p1149_p7 = por %p1148_p6, %p1147_p5 }
  0x2a   : > { %p1145_p4 = pneg %p1144_p3  ;;  %p1151_p13 = por %p1150_p10, %p1149_p7 }
  0x2c   : > { %p1152_p12 = pnand %p1151_p13, %p1145_p4 }
  0x2e   : > { %1155 = shalt.err (!%p1152_p12)
}
  0x2f   : > { %s1156_s19 = scalar_lea.vmem %s1456_s23, 1024  ;;  %s1319_s22 = smov [#allocation5]  }
  0x30   : > { %p1157_p1 = scmp.ne.s32.totalorder %s1456_s23, %s1156_s19  ;;  %s1161_s8 = sshll.u32 %s1319_s22, 4  ;;  %s1162_s8 = int_to_ptr.vmem [resolvable:$false] %s1161_s8 }
  0x31   : > { %s1163_s15 = scalar_lea.vmem %s1162_s8, 2048  ;;  %p1164_p9 = scmp.lt.s32.totalorder %s1456_s23, %s1162_s8 }
  0x32   : > { %p1159_p3 = pnand %p1157_p1, %p1464_p2  ;;  %p1165_p8 = scmp.lt.s32.totalorder %s1163_s15, %s1156_s19 }
  0x34   : > { %p1160_p11 = pneg %p1159_p3  ;;  %p1166_p5 = por %p1165_p8, %p1164_p9 }
  0x36   : > { %p1167_p6 = pnand %p1166_p5, %p1160_p11 }
  0x38   : > { %1170 = shalt.err (!%p1167_p6)
}
  0x39   : > { %s1700_s9 = smov 128   ;;  %s1321_s21 = smov 8  }
  0x3a   : > { %1067 = dma.hbm_to_vmem [thread:$0]  (!%p1440_p0), %s1454_s12, 1024, %s1456_s23, %s1458_s11, %s1700_s9, %s1700_s9, %s1321_s21  }
  0x3b   : > { %s1717_s10 = sshll.u32 %s1313_s28, 10  ;;  %p941_p8 = scmp.ge.s32.totalorder %s1317_s29, 1 }
  0x3c   : > { %s1496_s8 = scalar_lea.hbm %s1686_s5, %s1717_s10  ;;  %s1718_s15 = sshll.u32 %s1436_s17, 6 }
  0x3d   : > { %s334_s1 = scalar_lea.vmem [#allocation7], %s1718_s15  ;;  %p355_p9 = scmp.lt.s32.totalorder %s1317_s29, 3 }
  0x3e   : > { %s341_s26 = sshll.u32 %s334_s1, 4  ;;  %s932_s24 = sshll.u32 %s1436_s17, 4  ;;  %s1513_s26 = int_to_ptr.vmem [resolvable:$true] %s341_s26 }
  0x3f   : > { %p1502_p11 = pnand %p941_p8, %p355_p9  ;;  %s959_s7 = sshll.u32 %s1313_s28, 8 }
  0x40   : > { %s1511_s12 = scalar_lea.hbm %s1681_s0, %s959_s7  ;;  %s272_s10 = scalar_lea.vmem [#allocation2], %s932_s24 }
  0x41   : > { %s1719_s16 = scalar_select %p1502_p11, 1, 0 }
  0x42   : > { %s281_s1 = sshll.u32 %s272_s10, 4  ;;  %s269_s19 = scalar_lea.sflag [#allocation3], %s1436_s17  ;;  %s1515_s1 = int_to_ptr.vmem [resolvable:$true] %s281_s1 }
  0x43   : > { %s1171_s22 = scalar_lea.hbm %s1511_s12, 256  ;;  %s1176_s7 = scalar_lea.hbm %s1681_s0, 512 }
  0x44   : > { %p1172_p12 = scmp.ne.s32.totalorder %s1511_s12, %s1171_s22  ;;  %p1177_p10 = scmp.lt.u32.totalorder %s1511_s12, %s1681_s0 }
  0x45   : > { %p1178_p13 = scmp.lt.u32.totalorder %s1176_s7, %s1171_s22  ;;  %p1180_p3 = scmp.lt.u32.totalorder %s1171_s22, %s1511_s12 }
  0x46   : > { %p1174_p4 = pnand %p1172_p12, %p1464_p2 }
  0x47   : > { %p1179_p1 = por %p1178_p13, %p1177_p10 }
  0x48   : > { %p1175_p7 = pneg %p1174_p4 }
  0x49   : > { %p1181_p5 = por %p1180_p3, %p1179_p1 }
  0x4b   : > { %p1182_p6 = pnand %p1181_p5, %p1175_p7 }
  0x4d   : > { %1185 = shalt.err (!%p1182_p6)
}
  0x4e   : > { %s1186_s24 = scalar_lea.vmem %s1515_s1, 256  ;;  %s1322_s10 = smov [#allocation2]  }
  0x4f   : > { %p1187_p8 = scmp.ne.s32.totalorder %s1515_s1, %s1186_s24  ;;  %s1191_s15 = sshll.u32 %s1322_s10, 4  ;;  %s1192_s15 = int_to_ptr.vmem [resolvable:$false] %s1191_s15 }
  0x50   : > { %s1193_s9 = scalar_lea.vmem %s1192_s15, 512  ;;  %p1194_p4 = scmp.lt.s32.totalorder %s1515_s1, %s1192_s15 }
  0x51   : > { %p1189_p9 = pnand %p1187_p8, %p1464_p2  ;;  %p1195_p11 = scmp.lt.s32.totalorder %s1193_s9, %s1186_s24 }
  0x53   : > { %p1190_p12 = pneg %p1189_p9  ;;  %p1196_p10 = por %p1195_p11, %p1194_p4 }
  0x55   : > { %p1197_p13 = pnand %p1196_p10, %p1190_p12 }
  0x57   : > { %1200 = shalt.err (!%p1197_p13)
}
  0x58   : > { %s1720_s22 = smov 128   ;;  %s1201_s14 = scalar_lea.hbm %s1496_s8, 1024 }
  0x59   : > { %1064 = dma.hbm_to_vmem [thread:$0]  (!%p1440_p0), %s1511_s12, 256, %s1515_s1, %s269_s19, %s1720_s22, %s1720_s22, %s1321_s21  }
  0x5a   : > { %p1202_p7 = scmp.ne.s32.totalorder %s1496_s8, %s1201_s14  ;;  %s1206_s24 = scalar_lea.hbm %s1686_s5, 2048 }
  0x5b   : > { %p1207_p3 = scmp.lt.u32.totalorder %s1496_s8, %s1686_s5  ;;  %p1208_p5 = scmp.lt.u32.totalorder %s1206_s24, %s1201_s14 }
  0x5c   : > { %p1204_p11 = pnand %p1202_p7, %p1464_p2  ;;  %p1210_p8 = scmp.lt.u32.totalorder %s1201_s14, %s1496_s8 }
  0x5d   : > { %p1209_p6 = por %p1208_p5, %p1207_p3 }
  0x5e   : > { %p1205_p1 = pneg %p1204_p11 }
  0x5f   : > { %p1211_p9 = por %p1210_p8, %p1209_p6 }
  0x61   : > { %p1212_p12 = pnand %p1211_p9, %p1205_p1 }
  0x63   : > { %1215 = shalt.err (!%p1212_p12)
}
  0x64   : > { %s1216_s17 = scalar_lea.vmem %s1513_s26, 1024  ;;  %s1323_s12 = smov [#allocation7]  }
  0x65   : > { %p1217_p4 = scmp.ne.s32.totalorder %s1513_s26, %s1216_s17  ;;  %s1221_s1 = sshll.u32 %s1323_s12, 4  ;;  %s1222_s1 = int_to_ptr.vmem [resolvable:$false] %s1221_s1 }
  0x66   : > { %s1223_s19 = scalar_lea.vmem %s1222_s1, 2048  ;;  %p1224_p7 = scmp.lt.s32.totalorder %s1513_s26, %s1222_s1 }
  0x67   : > { %p1219_p10 = pnand %p1217_p4, %p1464_p2  ;;  %p1225_p11 = scmp.lt.s32.totalorder %s1223_s19, %s1216_s17 }
  0x69   : > { %p1220_p13 = pneg %p1219_p10  ;;  %p1226_p3 = por %p1225_p11, %p1224_p7 }
  0x6b   : > { %p1227_p5 = pnand %p1226_p3, %p1220_p13 }
  0x6d   : > { %1230 = shalt.err (!%p1227_p5)
}
  0x6e   : > { %1070 = dma.hbm_to_vmem [thread:$0]  (!%p1440_p0), %s1496_s8, 1024, %s1513_s26, %s1458_s11, %s1720_s22, %s1720_s22, %s1321_s21  }
  0x6f   : > { %p1721_p2 = scmp.ne.s32.totalorder %s1719_s16, 0 }
  0x70   : > { %s1572_s20 = sand.u32 (!%p1721_p2), 1, %s1301_s25   ;;  %p1722_p1 = scmp.ne.s32.totalorder (!%p1721_p2), %s1708_s13, 0 }
  0x71   : > { %359 = sbr.rel (%p1721_p2) target bundleno = 953 (0x3b9), region = 48  ;;  %s942_s9 = sshll.u32 (!%p1721_p2), %s1572_s20, 4 }
  0x72   : > { %s362_s14 = scalar_lea.sflag (!%p1721_p2), [#allocation3], %s1572_s20  ;;  %s1578_s18 = scalar_lea.vmem (!%p1721_p2), [#allocation2], %s942_s9 }
  0x78   : > { %1284 = dma.done.wait (%p1722_p1), %s362_s14, 256  }
  0x79   : > { %1286 = vsyncadd (%p1722_p1), %s362_s14, 4294967040  ;;  %s370_s26 = sand.u32 1, %s1398_s30   ;;  %s943_s16 = sshll.u32 %s1572_s20, 6 }
  0x7a   : > { %s371_s11 = scalar_lea.sflag [#allocation6], %s370_s26  ;;  %s374_s21 = scalar_lea.vmem [#allocation5], %s943_s16 }
  0x7b   : > { %1288 = dma.done.wait (%p1722_p1), %s371_s11, 2048  }
  0x7c   : > { %1290 = vsyncadd (%p1722_p1), %s371_s11, 4294965248  ;;  %v452_v0 = vld [vmem:[%s374_s21] sm:$0xff]  ;;  %v453_v1 = vld [vmem:[%s374_s21 + $0x8] sm:$0xff]  ;;  %vm467_vm0 = vcmask 523264   ;;  %p437_p0 = scmp.lt.s32.totalorder %s1309_s27, 1  ;;  %s383_s7 = scalar_lea.vmem [#allocation7], %s943_s16 }
  0x7d   : > { %v454_v2 = vld [vmem:[%s374_s21 + $0x10] sm:$0xff]  ;;  %v1021_v3 = vpack.c.bf16 %v453_v1, %v452_v0  ;;  %v455_v4 = vld [vmem:[%s374_s21 + $0x18] sm:$0xff]  ;;  %v456_v6 = vld [vmem:[%s374_s21 + $0x20] sm:$0xff]  ;;  %s435_s26 = scalar_lea.vmem [#allocation8], %s942_s9  ;;  %s962_s11 = sshll.u32 %s1309_s27, 8 }
  0x7e   : > { %v1025_v5 = vpack.c.bf16 %v455_v4, %v454_v2  ;;  %v457_v7 = vld [vmem:[%s374_s21 + $0x28] sm:$0xff]  ;;  %v450_v8 = vld [vmem:[%s1578_s18] sm:$0xff]  ;;  %v459_v11 = vld [vmem:[%s374_s21 + $0x38] sm:$0xff]  ;;  %s1598_s30 = scalar_select %p437_p0, %s1309_s27, 1 }
  0x7f   : > { %1022 = vmatprep.subr.bf16.mxu0 %v1021_v3  ;;  %999 = vmatprep.mubr.msk.f32.mxu0 %vm467_vm0, %v450_v8  ;;  %v1029_v9 = vpack.c.bf16 %v457_v7, %v456_v6  ;;  %v458_v10 = vld [vmem:[%s374_s21 + $0x30] sm:$0xff]  ;;  %v451_v13 = vld [vmem:[%s1578_s18 + $0x8] sm:$0xff]  ;;  %s1723_s18 = sld [smem:[#allocation15_spill]]  ;;  %s762_s16 = sshll.u32 %s435_s26, 4  ;;  %s1627_s16 = int_to_ptr.vmem [resolvable:$true] %s762_s16 }
  0x80   : > { %1024 = vmatpush3.bf16.msra.mxu0 %v1021_v3  ;;  %v1033_v12 = vpack.c.bf16 %v459_v11, %v458_v10  ;;  %s439_s22 = scalar_lea.vmem %s1683_s2, %s1598_s30  ;;  %s442_s10 = scalar_lea.vmem %s1684_s3, %s1598_s30 }
  0x81   : > { %1026 = vmatprep.subr.bf16.mxu0 %v1025_v5  ;;  %v946_v14 = vld [vmem:[%s439_s22] ss:$0 sm:$0xff]  ;;  %s445_s12 = scalar_lea.vmem %s1685_s4, %s1598_s30  ;;  %s448_s14 = scalar_lea.vmem %s1687_s6, %s1598_s30 }
  0x82   : > { %s1724_s8 = sld [smem:[#allocation19_spill]]  ;;  %s747_s9 = scalar_lea.sflag [#allocation4], %s1572_s20 }
  0x83   : > { %s1231_s30 = scalar_lea.vmem %s1627_s16, 256  ;;  %s1324_s27 = smov [#allocation8]  }
  0x84   : > { %1028 = vmatpush3.bf16.msra.mxu0 %v1025_v5  ;;  %p1232_p6 = scmp.ne.s32.totalorder %s1627_s16, %s1231_s30 }
  0x85   : > { %1030 = vmatprep.subr.bf16.mxu0 %v1029_v9  ;;  %p1725_p8 = scmp.ne.s32.totalorder %s1723_s18, 0 }
  0x87   : > { %p1233_p9 = pnand %p1232_p6, %p1725_p8 }
  0x88   : > { %1032 = vmatpush3.bf16.msra.mxu0 %v1029_v9  ;;  %s1632_s22 = scalar_lea.hbm %s1724_s8, %s962_s11 }
  0x89   : > { %1034 = vmatprep.subr.bf16.mxu0 %v1033_v12  ;;  %p1234_p12 = pneg %p1233_p9 }
  0x8c   : > { %1036 = vmatpush3.bf16.msra.mxu0 %v1033_v12 }
  0x8f   : > { %1000 = vmatmul.mubr.msk.f32.vlgmr.msra.gmra.mrb[0].mxu0 %vm467_vm0, %v451_v13 }
 0x162   : > { %v1001_v15 = vpop.f32.mrb[0].mxu0 }
 0x163   : > { %v546_v16 = vadd.f32 %v1001_v15, %v946_v14  ;;  %v540_v17 = vpop.f32.mrb[1].mxu0 }
 0x164   : > { %v541_v18 = vadd.f32 %v946_v14, %v540_v17  ;;  %v648_v17 = vld [vmem:[%s383_s7] sm:$0xff] }
 0x165   : > { %v552_v19 = vmul.f32 0.70710677, %v546_v16  ;;  %v550_v2 = vmul.f32 0.5, %v546_v16 }
 0x166   : > { %v551_v20 = vmul.f32 0.70710677, %v541_v18  ;;  %v549_v63 = vmul.f32 0.5, %v541_v18  ;;  %v649_v18 = vld [vmem:[%s383_s7 + $0x8] sm:$0xff] }
 0x167   : > { %v554_v21 = vand.u32 2147483647, %v552_v19  ;;  %vm594_vm1 = vcmp.lt.f32.partialorder %v552_v19, 0.0  ;;  %v1037_v19 = vpack.c.bf16 %v649_v18, %v648_v17 }
 0x168   : > { %v553_v22 = vand.u32 2147483647, %v551_v20  ;;  %vm593_vm2 = vcmp.lt.f32.partialorder %v551_v20, 0.0  ;;  %v650_v20 = vld [vmem:[%s383_s7 + $0x10] sm:$0xff] }
 0x169   : > { %v556_v23 = vmul.f32 0.3275911, %v554_v21  ;;  %v582_v27 = vsub.f32 0.0, %v554_v21  ;;  %1038 = vmatprep.subr.bf16.mxu1 %v1037_v19 }
 0x16a   : > { %v555_v24 = vmul.f32 0.3275911, %v553_v22  ;;  %v581_v28 = vsub.f32 0.0, %v553_v22  ;;  %1040 = vmatpush3.bf16.msra.mxu1 %v1037_v19 }
 0x16b   : > { %v558_v25 = vadd.f32 1.0, %v556_v23  ;;  %v584_v30 = vmul.f32 %v582_v27, %v554_v21  ;;  %v651_v21 = vld [vmem:[%s383_s7 + $0x18] sm:$0xff] }
 0x16c   : > { %v557_v26 = vadd.f32 1.0, %v555_v24  ;;  %v583_v32 = vmul.f32 %v581_v28, %v553_v22  ;;  %v652_v22 = vld [vmem:[%s383_s7 + $0x20] sm:$0xff]  ;;  %v1041_v23 = vpack.c.bf16 %v651_v21, %v650_v20  ;;  %v653_v24 = vld [vmem:[%s383_s7 + $0x28] sm:$0xff]  ;;  %v655_v27 = vld [vmem:[%s383_s7 + $0x38] sm:$0xff] }
 0x16d   : > { %1129 = vrcp.f32 %v558_v25  ;;  %v587_v36 = vmul.f32 1.442695, %v584_v30  ;;  %v1045_v25 = vpack.c.bf16 %v653_v24, %v652_v22 }
 0x16e   : > { %1131 = vrcp.f32 %v557_v26  ;;  %v585_v38 = vmul.f32 1.442695, %v583_v32  ;;  %1042 = vmatprep.subr.bf16.mxu1 %v1041_v23  ;;  %v654_v26 = vld [vmem:[%s383_s7 + $0x30] sm:$0xff]  ;;  %s1235_s7 = sshll.u32 %s1324_s27, 4  ;;  %s1236_s7 = int_to_ptr.vmem [resolvable:$false] %s1235_s7 }
 0x16f   : > { %1133 = vpow2.f32 %v587_v36  ;;  %1044 = vmatpush3.bf16.msra.mxu1 %v1041_v23  ;;  %v1049_v28 = vpack.c.bf16 %v655_v27, %v654_v26  ;;  %v949_v36 = vld [vmem:[%s442_s10] ss:$0 sm:$0xff]  ;;  %s1237_s23 = scalar_lea.vmem %s1236_s7, 512  ;;  %p1238_p4 = scmp.lt.s32.totalorder %s1627_s16, %s1236_s7 }
 0x170   : > { %1135 = vpow2.f32 %v585_v38  ;;  %1046 = vmatprep.subr.bf16.mxu1 %v1045_v25  ;;  %v950_v38 = vld [vmem:[%s445_s12] ss:$0 sm:$0xff]  ;;  %p1239_p10 = scmp.lt.s32.totalorder %s1237_s23, %s1231_s30 }
 0x172   : > { %p1240_p13 = por %p1239_p10, %p1238_p4 }
 0x173   : > { %1048 = vmatpush3.bf16.msra.mxu1 %v1045_v25 }
 0x174   : > { %1050 = vmatprep.subr.bf16.mxu1 %v1049_v28  ;;  %p1241_p7 = pnand %p1240_p13, %p1234_p12 }
 0x177   : > { %v1130_v29 = vpop.eup %1129  ;;  %1052 = vmatpush3.bf16.msra.mxu1 %v1049_v28 }
 0x178   : > { %v1132_v31 = vpop.eup %1131  ;;  %v564_v33 = vmul.f32 1.0614054, %v1130_v29 }
 0x179   : > { %v563_v34 = vmul.f32 1.0614054, %v1132_v31  ;;  %v1134_v52 = vpop.eup %1133 }
 0x17a   : > { %v566_v35 = vadd.f32 -1.4531521, %v564_v33  ;;  %v1136_v54 = vpop.eup %1135 }
 0x17b   : > { %v565_v37 = vadd.f32 -1.4531521, %v563_v34 }
 0x17c   : > { %v568_v39 = vmul.f32 %v1130_v29, %v566_v35 }
 0x17d   : > { %v567_v40 = vmul.f32 %v1132_v31, %v565_v37 }
 0x17e   : > { %v570_v41 = vadd.f32 1.4214138, %v568_v39 }
 0x17f   : > { %v569_v42 = vadd.f32 1.4214138, %v567_v40 }
 0x180   : > { %v572_v43 = vmul.f32 %v1130_v29, %v570_v41 }
 0x181   : > { %v571_v44 = vmul.f32 %v1132_v31, %v569_v42 }
 0x182   : > { %v574_v45 = vadd.f32 -0.28449672, %v572_v43 }
 0x183   : > { %v573_v46 = vadd.f32 -0.28449672, %v571_v44 }
 0x184   : > { %v576_v47 = vmul.f32 %v1130_v29, %v574_v45  ;;  %v951_v45 = vld [vmem:[%s448_s14] ss:$0 sm:$0xff] }
 0x185   : > { %v575_v48 = vmul.f32 %v1132_v31, %v573_v46 }
 0x186   : > { %v578_v49 = vadd.f32 0.2548296, %v576_v47 }
 0x187   : > { %v577_v50 = vadd.f32 0.2548296, %v575_v48 }
 0x188   : > { %v580_v51 = vmul.f32 %v1130_v29, %v578_v49 }
 0x189   : > { %v579_v53 = vmul.f32 %v1132_v31, %v577_v50 }
 0x18a   : > { %v590_v55 = vmul.f32 %v1134_v52, %v580_v51 }
 0x18b   : > { %v589_v56 = vmul.f32 %v1136_v54, %v579_v53 }
 0x18c   : > { %v592_v57 = vsub.f32 1.0, %v590_v55 }
 0x18d   : > { %v591_v58 = vsub.f32 1.0, %v589_v56 }
 0x18e   : > { %v596_v59 = vsub.f32 0.0, %v592_v57 }
 0x18f   : > { %v595_v60 = vsub.f32 0.0, %v591_v58 }
 0x190   : > { %v598_v61 = vsel %vm594_vm1, %v596_v59, %v592_v57 }
 0x191   : > { %v597_v62 = vsel %vm593_vm2, %v595_v60, %v591_v58  ;;  %v600_v1 = vadd.f32 1.0, %v598_v61 }
 0x192   : > { %v599_v0 = vadd.f32 1.0, %v597_v62 }
 0x193   : > { %v602_v5 = vmul.f32 %v600_v1, %v550_v2 }
 0x194   : > { %v601_v3 = vmul.f32 %v599_v0, %v549_v63 }
 0x195   : > { %v606_v6 = vsel %vm467_vm0, %v602_v5, 0.0 }
 0x196   : > { %v603_v4 = vsel %vm467_vm0, %v601_v3, 0.0 }
 0x197   : > { %604 = vadd.xlane.f32.xlu0 %v603_v4 }
 0x19b   : > { %607 = vadd.xlane.f32.xlu0 %v606_v6 }
 0x224   : > { %v605_v7 = vpop.xlane.xlu0 %604 }
 0x225   : > { %v610_v8 = vmul.f32 0.015625, %v605_v7 }
 0x227   : > { %v612_v9 = vsub.f32 %v601_v3, %v610_v8 }
 0x228   : > { %v608_v10 = vpop.xlane.xlu0 %607 }
 0x229   : > { %v611_v11 = vmul.f32 0.015625, %v608_v10  ;;  %v614_v12 = vmul.f32 %v612_v9, %v612_v9 }
 0x22b   : > { %v613_v13 = vsub.f32 %v602_v5, %v611_v11  ;;  %v616_v14 = vsel %vm467_vm0, %v614_v12, 0.0 }
 0x22c   : > { %617 = vadd.xlane.f32.xlu1 %v616_v14 }
 0x22d   : > { %v615_v15 = vmul.f32 %v613_v13, %v613_v13 }
 0x22f   : > { %v619_v16 = vsel %vm467_vm0, %v615_v15, 0.0 }
 0x230   : > { %620 = vadd.xlane.f32.xlu1 %v619_v16 }
 0x2b9   : > { %v618_v29 = vpop.xlane.xlu1 %617 }
 0x2ba   : > { %v622_v30 = vmul.f32 0.015625, %v618_v29 }
 0x2bc   : > { %v624_v31 = vadd.f32 1e-12, %v622_v30 }
 0x2bd   : > { %v621_v32 = vpop.xlane.xlu1 %620 }
 0x2be   : > { %1137 = vrsqrt.f32 %v624_v31  ;;  %v623_v33 = vmul.f32 0.015625, %v621_v32 }
 0x2c0   : > { %v625_v34 = vadd.f32 1e-12, %v623_v33 }
 0x2c2   : > { %1139 = vrsqrt.f32 %v625_v34 }
 0x2c8   : > { %v1138_v35 = vpop.eup %1137 }
 0x2c9   : > { %v628_v37 = vmul.f32 %v1138_v35, %v612_v9 }
 0x2cb   : > { %v637_v39 = vmul.f32 %v949_v36, %v628_v37 }
 0x2cc   : > { %v1140_v40 = vpop.eup %1139 }
 0x2cd   : > { %v629_v41 = vmul.f32 %v1140_v40, %v613_v13  ;;  %v646_v42 = vadd.f32 %v950_v38, %v637_v39 }
 0x2cf   : > { %v638_v43 = vmul.f32 %v949_v36, %v629_v41  ;;  %1018 = vmatprep.mubr.msk.f32.mxu1 %vm467_vm0, %v646_v42 }
 0x2d1   : > { %v647_v44 = vadd.f32 %v950_v38, %v638_v43 }
 0x2d3   : > { %1019 = vmatmul.mubr.msk.f32.vlgmr.msra.gmra.mrb[0].mxu1 %vm467_vm0, %v647_v44 }
 0x3a6   : > { %v1020_v46 = vpop.f32.mrb[0].mxu1 }
 0x3a7   : > { %v741_v47 = vadd.f32 %v1020_v46, %v951_v45  ;;  %v735_v48 = vpop.f32.mrb[1].mxu1 }
 0x3a8   : > { %v736_v49 = vadd.f32 %v951_v45, %v735_v48 }
 0x3a9   : > { %745 = vst [vmem:[%s435_s26 + $0x8] sm:$0xff] %v741_v47 }
 0x3aa   : > { %744 = vst [vmem:[%s435_s26] sm:$0xff] %v736_v49 }
 0x3ab   : > { %1244 = shalt.err (!%p1241_p7)
}
 0x3ac   : > { %s1245_s24 = scalar_lea.hbm %s1632_s22, 256  ;;  %s1249_s17 = scalar_lea.hbm %s1724_s8, 512 }
 0x3ad   : > { %p1246_p11 = scmp.ne.s32.totalorder %s1632_s22, %s1245_s24  ;;  %p1250_p2 = scmp.lt.u32.totalorder %s1632_s22, %s1724_s8 }
 0x3ae   : > { %p1251_p1 = scmp.lt.u32.totalorder %s1249_s17, %s1245_s24  ;;  %p1253_p6 = scmp.lt.u32.totalorder %s1245_s24, %s1632_s22 }
 0x3af   : > { %p1247_p3 = pnand %p1246_p11, %p1725_p8 }
 0x3b0   : > { %p1252_p0 = por %p1251_p1, %p1250_p2 }
 0x3b1   : > { %p1248_p5 = pneg %p1247_p3 }
 0x3b2   : > { %p1254_p9 = por %p1253_p6, %p1252_p0 }
 0x3b4   : > { %p1255_p12 = pnand %p1254_p9, %p1248_p5 }
 0x3b6   : > { %1258 = shalt.err (!%p1255_p12)
}
 0x3b7   : > { %s1325_s19 = smov 128   ;;  %s1326_s14 = smov 8  }
 0x3b8   : > { %1059 = dma.vmem_to_hbm [thread:$0]  (%p1725_p8), %s1627_s16, 256, %s1632_s22, %s747_s9, %s1325_s19, %s1325_s19, %s1326_s14  }
 0x3b9 PF: > { %s1726_s26 = sld [smem:[#allocation12_spill]]  ;;  %s1727_s11 = sld [smem:[#allocation17_spill]] }
 0x3ba   : > { %p1729_p10 = scmp.ge.s32.totalorder %s1317_s29, 2 }
 0x3bf   : > { %s777_s21 = sand.u32 1, %s1726_s26   ;;  %p1728_p4 = scmp.ne.s32.totalorder %s1727_s11, 0 }
 0x3c0   : > { %s778_s13 = scalar_lea.sflag [#allocation4], %s777_s21 }
 0x3c1   : > { %p1072_p13 = pnand %p1729_p10, %p1728_p4 }
 0x3c3   : > { %1292 = dma.done.wait (!%p1072_p13), %s778_s13, 256  }
 0x3c4   : > { %1294 = vsyncadd (!%p1072_p13), %s778_s13, 4294967040  ;;  %s26_s29 = sadd.s32 1, %s1317_s29   ;;  %s1730_s30 = sld [smem:[#allocation13_spill]] }
 0x3c5   : > { %p23_p7 = scmp.ge.s32.totalorder %s26_s29, 4   ;;  %s1731_s26 = sld [smem:[#allocation16_spill]] }
 0x3c6   : > { %s1732_s20 = sld [smem:[#allocation14_spill]]  ;;  %s1733_s24 = smov %s1301_s25 }
 0x3c7   : > { %s1735_s27 = smov %s1313_s28  ;;  %25 = sbr.rel (!%p23_p7) target bundleno = 11 (0xb), region = 129 }
 0x3ca   : > { %s1734_s25 = smov %s1730_s30 }
 0x3cc   : > { %s1736_s28 = smov %s1732_s20 }
 0x3ce   :  { %783 = vsyncpa [#allocation3], 1 }
 0x3cf   :  { %785 = vsyncpa [#allocation3 + $0x1], 1 }
 0x3d0   :  { %786 = vsyncpa [#allocation6], 1 }
 0x3d1   :  { %788 = vsyncpa [#allocation6 + $0x1], 1 }
 0x3d2   :  { %789 = vsyncpa [#allocation4], 1 }
 0x3d3   :  { %791 = vsyncpa [#allocation4 + $0x1], 1 }

</bundles_post_ra>
